<compile_context>
chip_gen: v6e
topology: v6e:2x2x1
jax: 0.10.0
libtpu: 0.0.40
codegen_flags: <defaults>
</compile_context>

<pallas_src>
import jax
import jax.numpy as jnp
from jax import lax
from jax.experimental import pallas as pl
from jax.experimental.pallas import tpu as pltpu

# ---- synthetic config (mirrors gc.config / gc.* of the reference) -----------
DIM_L = 32          # gc.dim_l           (word feature dim)
DIM_A_RAW = 20      # raw covarep feature dim
DIM_V_RAW = 24      # raw facet   feature dim
PROJ_DIM_A = 16     # conf['proj_dim_a']
PROJ_DIM_V = 16     # conf['proj_dim_v']
N_LAYERS = 2        # conf['n_layers']
DIM_TOTAL = DIM_L + PROJ_DIM_A + PROJ_DIM_V        # 64
FFN_DIM = 2 * DIM_TOTAL                            # 128
DIM_TOTAL_PROJ = 32  # conf['dim_total_proj']  (GRU hidden size)
FINAL_OUT_DIM = 1    # dataset not in {iemocap, mosei_new, pom}
BATCH = 2
SEQ = 8
ROWS = BATCH * SEQ   # 16 rows, TIME-major ordering (row = t*BATCH + b)
IN_DIM = DIM_L + DIM_A_RAW + DIM_V_RAW + 1         # 77 (trailing ones column)

# EUP approximate reciprocal in the softmax denominator: attention rows do not
# sum to *exactly* 1 (fine for inference, will not bit-match PyTorch).
APPROX_SOFTMAX = True


# =============================== Pallas kernel ===============================

def net_kernel(x_ref, bias_ref, ew_ref, wqkv_ref, wo_ref, w1_ref, w2_ref,
               vecs_ref, gruw_ref, gruv_ref, o_ref):
    f32 = jnp.float32
    D = DIM_TOTAL
    H = DIM_TOTAL_PROJ

    # ---- modality projections + concat + biases: ONE packed matmul ----------
    # x = [words | covarep | facet | 1];  ew has identity/Wa/Wv blocks + bias row.
    state = jnp.dot(x_ref[...], ew_ref[...], preferred_element_type=f32)  # (R, D)

    attn_bias = bias_ref[...]   # (R, R) block-diagonal mask, precomputed.
    # NOTE: every row has unmasked entries (its own batch), so softmax is never 0/0.

    def layer_norm(h, g, b):
        mu = jnp.mean(h, axis=-1, keepdims=True)
        var = jnp.mean((h - mu) ** 2, axis=-1, keepdims=True)
        return (h - mu) * lax.rsqrt(var + 1e-5) * g + b

    # ---- transformer encoder stack (post-norm, single head) -----------------
    for l in range(N_LAYERS):
        x = state
        vecs = vecs_ref[l]                                    # (8, 3D) bias/LN slab

        # Fused Q|K|V projection (1/sqrt(d) folded into the Q columns at init).
        qkv = (jnp.dot(x, wqkv_ref[l], preferred_element_type=f32)
               + vecs[0:1, :])                                # (R, 3D)
        q = qkv[:, 0:D]
        k = qkv[:, D:2 * D]
        v = qkv[:, 2 * D:3 * D]

        # q @ k^T via transposed contraction (no materialized transpose of k).
        s = lax.dot_general(q, k, (((1,), (1,)), ((), ())),
                            preferred_element_type=f32) + attn_bias
        s = s - jnp.max(s, axis=-1, keepdims=True)
        p = jnp.exp(s)
        p = p * pl.reciprocal(jnp.sum(p, axis=-1, keepdims=True),
                              approx=APPROX_SOFTMAX)

        att = jnp.dot(p, v, preferred_element_type=f32)
        att = (jnp.dot(att, wo_ref[l], preferred_element_type=f32)
               + vecs[1:2, 0:D])

        h1 = layer_norm(x + att, vecs[4:5, 0:D], vecs[5:6, 0:D])

        ff = (jnp.dot(h1, w1_ref[l], preferred_element_type=f32)
              + vecs[2:3, 0:FFN_DIM])
        ff = jnp.maximum(ff, 0.0)
        ff = (jnp.dot(ff, w2_ref[l], preferred_element_type=f32)
              + vecs[3:4, 0:D])

        state = layer_norm(h1 + ff, vecs[6:7, 0:D], vecs[7:8, 0:D])

    # -------------------------------- GRU ------------------------------------
    w_ih = gruw_ref[0:D, :]                                   # (D, 3H)
    w_hh = gruw_ref[D:D + H, :]                               # (H, 3H)
    fin_w = gruw_ref[D + H:D + 2 * H, 0:FINAL_OUT_DIM]        # (H, 1)
    gvecs = gruv_ref[...]                                     # (8, 3H)
    gi_bias = gvecs[0:1, :]          # b_ih + (b_hr, b_hz, 0)  (folded at init)
    b_hn = gvecs[1:2, 0:H]           # kept separate: multiplied by r inside n
    fin_b = gvecs[2:3, 0:FINAL_OUT_DIM]

    # Input-to-hidden matmul hoisted out of the recurrence.  Rows are already
    # time-major, so each step's slab is a contiguous static row slice.
    gi = jnp.dot(state, w_ih, preferred_element_type=f32) + gi_bias    # (R, 3H)
    gi_rz = gi[:, 0:2 * H]      # lane-aligned slice, hoisted out of the loop
    gi_n = gi[:, 2 * H:3 * H]   # single lane rotation, hoisted out of the loop

    h = jnp.zeros((BATCH, H), f32)
    for t in range(SEQ):        # static unroll; hidden state stays in vregs
        r0 = t * BATCH
        gh = jnp.dot(h, w_hh, preferred_element_type=f32)               # (B, 3H)
        # r and z from one contiguous 64-lane slice with a single sigmoid.
        rz = jax.nn.sigmoid(gi_rz[r0:r0 + BATCH, :] + gh[:, 0:2 * H])
        r = rz[:, 0:H]
        z = rz[:, H:2 * H]
        n = jnp.tanh(gi_n[r0:r0 + BATCH, :] + r * (gh[:, 2 * H:3 * H] + b_hn))
        h = n + z * (h - n)     # == (1 - z) * n + z * h

    # ------------------------------ finalW ------------------------------------
    out = jnp.dot(h, fin_w, preferred_element_type=f32) + fin_b        # (B, 1)
    o_ref[...] = out.astype(o_ref.dtype)


# ============================ parameters & forward ===========================

def _dense(key, din, dout, scale=0.1):
    return (scale * jax.random.normal(key, (din, dout), jnp.float32),
            jnp.zeros((1, dout), jnp.float32))


def _pad_lanes(v, width):
    return jnp.pad(v, ((0, 0), (0, width - v.shape[-1])))


def init_params(key):
    keys = iter(jax.random.split(key, 32))
    f32 = jnp.float32
    p = {}

    proj_a_w, proj_a_b = _dense(next(keys), DIM_A_RAW, PROJ_DIM_A)
    proj_v_w, proj_v_b = _dense(next(keys), DIM_V_RAW, PROJ_DIM_V)

    # Packed "embedding" weight implementing
    #   concat([words, cov @ Wa + ba, fac @ Wv + bv])  exactly
    # (identity block for words; bias row picked up by the ones column of x).
    emb_w = jnp.zeros((IN_DIM, DIM_TOTAL), f32)
    emb_w = emb_w.at[:DIM_L, :DIM_L].set(jnp.eye(DIM_L, dtype=f32))
    emb_w = emb_w.at[DIM_L:DIM_L + DIM_A_RAW,
                     DIM_L:DIM_L + PROJ_DIM_A].set(proj_a_w)
    emb_w = emb_w.at[DIM_L + DIM_A_RAW:DIM_L + DIM_A_RAW + DIM_V_RAW,
                     DIM_L + PROJ_DIM_A:].set(proj_v_w)
    emb_w = emb_w.at[-1, DIM_L:DIM_L + PROJ_DIM_A].set(proj_a_b[0])
    emb_w = emb_w.at[-1, DIM_L + PROJ_DIM_A:].set(proj_v_b[0])
    p['emb_w'] = emb_w

    scale = 1.0 / (float(DIM_TOTAL) ** 0.5)   # folded into Wq / bq
    wqkv_l, wo_l, w1_l, w2_l, vecs_l = [], [], [], [], []
    for _ in range(N_LAYERS):
        wq, bq = _dense(next(keys), DIM_TOTAL, DIM_TOTAL)
        wk, bk = _dense(next(keys), DIM_TOTAL, DIM_TOTAL)
        wv, bv = _dense(next(keys), DIM_TOTAL, DIM_TOTAL)
        wo, bo = _dense(next(keys), DIM_TOTAL, DIM_TOTAL)
        w1, b1 = _dense(next(keys), DIM_TOTAL, FFN_DIM)
        w2, b2 = _dense(next(keys), FFN_DIM, DIM_TOTAL)
        g1 = jnp.ones((1, DIM_TOTAL), f32)
        be1 = jnp.zeros((1, DIM_TOTAL), f32)
        g2 = jnp.ones((1, DIM_TOTAL), f32)
        be2 = jnp.zeros((1, DIM_TOTAL), f32)

        wqkv_l.append(jnp.concatenate([wq * scale, wk, wv], axis=1))  # (64,192)
        wo_l.append(wo)
        w1_l.append(w1)
        w2_l.append(w2)
        bqkv = jnp.concatenate([bq * scale, bk, bv], axis=1)          # (1,192)
        rows = [bqkv, bo, b1, b2, g1, be1, g2, be2]
        vecs_l.append(jnp.concatenate(
            [_pad_lanes(r, 3 * DIM_TOTAL) for r in rows], axis=0))    # (8,192)

    p['wqkv'] = jnp.stack(wqkv_l)          # (L, 64, 192)
    p['wo'] = jnp.stack(wo_l)              # (L, 64, 64)
    p['w1'] = jnp.stack(w1_l)              # (L, 64, 128)
    p['w2'] = jnp.stack(w2_l)              # (L, 128, 64)
    p['enc_vecs'] = jnp.stack(vecs_l)      # (L, 8, 192)

    # GRU (input_size=DIM_TOTAL, hidden_size=DIM_TOTAL_PROJ), gate order r,z,n.
    H = DIM_TOTAL_PROJ
    w_ih = 0.1 * jax.random.normal(next(keys), (DIM_TOTAL, 3 * H), f32)
    w_hh = 0.1 * jax.random.normal(next(keys), (H, 3 * H), f32)
    b_ih = jnp.zeros((1, 3 * H), f32)
    b_hh = jnp.zeros((1, 3 * H), f32)
    fin_w, fin_b = _dense(next(keys), H, FINAL_OUT_DIM)

    # gru_w slab: [W_ih (64 rows) | W_hh (32 rows) | finalW (32 rows, lane-pad)]
    p['gru_w'] = jnp.concatenate(
        [w_ih, w_hh, _pad_lanes(fin_w, 3 * H)], axis=0)        # (128, 96)

    # gru_vecs slab: row0 = b_ih + (b_hr, b_hz, 0); row1 = b_hn; row2 = final_b.
    gi_bias = b_ih + jnp.concatenate(
        [b_hh[:, 0:2 * H], jnp.zeros((1, H), f32)], axis=1)
    p['gru_vecs'] = jnp.concatenate(
        [gi_bias,
         _pad_lanes(b_hh[:, 2 * H:3 * H], 3 * H),
         _pad_lanes(fin_b, 3 * H),
         jnp.zeros((5, 3 * H), f32)], axis=0)                  # (8, 96)

    return p


@jax.jit
def net_forward(params, words, covarep, facet, input_lens):
    # input_lens is accepted but unused, matching the reference forward().
    del input_lens
    B, S, _ = words.shape
    R = B * S

    # Time-major row order (row = t*B + b); wrapper transposes of ~4 KB tensors
    # are noise, and they remove the permutation matmul from the kernel.
    w = jnp.transpose(words, (1, 0, 2)).reshape(R, DIM_L)
    c = jnp.transpose(covarep, (1, 0, 2)).reshape(R, DIM_A_RAW)
    f = jnp.transpose(facet, (1, 0, 2)).reshape(R, DIM_V_RAW)
    ones = jnp.ones((R, 1), jnp.float32)
    x_in = jnp.concatenate([w, c, f, ones], axis=-1)           # (R, 77)

    # Block-diagonal attention bias (compile-time constant, 1 KB input).
    ridx = jnp.arange(R)
    same_batch = (ridx[:, None] % B) == (ridx[None, :] % B)
    attn_bias = jnp.where(same_batch, 0.0, -1e30).astype(jnp.float32)

    vmem = pl.BlockSpec(memory_space=pltpu.MemorySpace.VMEM)

    # Single fused kernel, no grid (one invocation), everything in VMEM.
    # TODO(synk): on v7x the second TensorCore stays idle; add a parallel grid
    # over batch groups only if BATCH grows beyond a couple of sequences.
    out = pl.pallas_call(
        net_kernel,
        out_shape=jax.ShapeDtypeStruct((B, FINAL_OUT_DIM), jnp.float32),
        in_specs=[vmem] * 10,
        out_specs=vmem,
    )(x_in, attn_bias, params['emb_w'], params['wqkv'], params['wo'],
      params['w1'], params['w2'], params['enc_vecs'],
      params['gru_w'], params['gru_vecs'])

    # finalW(gru_last_h.squeeze()).squeeze()
    return jnp.squeeze(out)                                    # (B,)


if __name__ == "__main__":
    key = jax.random.PRNGKey(0)
    k_p, k_w, k_a, k_v = jax.random.split(key, 4)

    params = init_params(k_p)
    words = jax.random.normal(k_w, (BATCH, SEQ, DIM_L), jnp.float32)
    covarep = jax.random.normal(k_a, (BATCH, SEQ, DIM_A_RAW), jnp.float32)
    facet = jax.random.normal(k_v, (BATCH, SEQ, DIM_V_RAW), jnp.float32)
    input_lens = jnp.full((BATCH,), SEQ, jnp.int32)

    out = net_forward(params, words, covarep, facet, input_lens)
    jax.block_until_ready(out)
    assert out.shape == (BATCH,), out.shape
    print("KERNEL_OK")
</pallas_src>

<mosaic_0001>
module attributes {stable_mosaic.version = 11 : i64} {
  func.func @net_kernel(%arg0: memref<16x77xf32, #tpu.memory_space<vmem>>, %arg1: memref<16x16xf32, #tpu.memory_space<vmem>>, %arg2: memref<77x64xf32, #tpu.memory_space<vmem>>, %arg3: memref<2x64x192xf32, #tpu.memory_space<vmem>>, %arg4: memref<2x64x64xf32, #tpu.memory_space<vmem>>, %arg5: memref<2x64x128xf32, #tpu.memory_space<vmem>>, %arg6: memref<2x128x64xf32, #tpu.memory_space<vmem>>, %arg7: memref<2x8x192xf32, #tpu.memory_space<vmem>>, %arg8: memref<128x96xf32, #tpu.memory_space<vmem>>, %arg9: memref<8x96xf32, #tpu.memory_space<vmem>>, %arg10: memref<2x1xf32, #tpu.memory_space<vmem>>) attributes {dimension_semantics = [], scalar_prefetch = 0 : i64, scratch_operands = 0 : i64, tpu.core_type = #tpu.core_type<tc>} {
    %c0 = arith.constant 0 : index
    %c0_0 = arith.constant 0 : index
    %0 = vector.load %arg0[%c0, %c0_0] : memref<16x77xf32, #tpu.memory_space<vmem>>, vector<16x77xf32>
    %c0_1 = arith.constant 0 : index
    %c0_2 = arith.constant 0 : index
    %1 = vector.load %arg2[%c0_1, %c0_2] : memref<77x64xf32, #tpu.memory_space<vmem>>, vector<77x64xf32>
    %cst = arith.constant dense<0.000000e+00> : vector<16x64xf32>
    %2 = tpu.matmul %0, %1, %cst {dimension_numbers = #tpu.dot_dimension_numbers<[1], [0], [0], [1], [0, 0, 1, 1], [], []>} : vector<16x77xf32>, vector<77x64xf32>, vector<16x64xf32> -> vector<16x64xf32>
    %c0_3 = arith.constant 0 : index
    %c0_4 = arith.constant 0 : index
    %3 = vector.load %arg1[%c0_3, %c0_4] : memref<16x16xf32, #tpu.memory_space<vmem>>, vector<16x16xf32>
    %c0_5 = arith.constant 0 : index
    %c0_6 = arith.constant 0 : index
    %c0_7 = arith.constant 0 : index
    %4 = vector.load %arg7[%c0_5, %c0_6, %c0_7] : memref<2x8x192xf32, #tpu.memory_space<vmem>>, vector<1x8x192xf32>
    %5 = vector.shape_cast %4 : vector<1x8x192xf32> to vector<8x192xf32>
    %c0_8 = arith.constant 0 : index
    %c0_9 = arith.constant 0 : index
    %c0_10 = arith.constant 0 : index
    %6 = vector.load %arg3[%c0_8, %c0_9, %c0_10] : memref<2x64x192xf32, #tpu.memory_space<vmem>>, vector<1x64x192xf32>
    %7 = vector.shape_cast %6 : vector<1x64x192xf32> to vector<64x192xf32>
    %cst_11 = arith.constant dense<0.000000e+00> : vector<16x192xf32>
    %8 = tpu.matmul %2, %7, %cst_11 {dimension_numbers = #tpu.dot_dimension_numbers<[1], [0], [0], [1], [0, 0, 1, 1], [], []>} : vector<16x64xf32>, vector<64x192xf32>, vector<16x192xf32> -> vector<16x192xf32>
    %9 = vector.extract_strided_slice %5 {offsets = [0, 0], sizes = [1, 192], strides = [1, 1]} : vector<8x192xf32> to vector<1x192xf32>
    %10 = vector.broadcast %9 : vector<1x192xf32> to vector<16x192xf32>
    %11 = arith.addf %8, %10 : vector<16x192xf32>
    %12 = vector.extract_strided_slice %11 {offsets = [0, 0], sizes = [16, 64], strides = [1, 1]} : vector<16x192xf32> to vector<16x64xf32>
    %13 = vector.extract_strided_slice %11 {offsets = [0, 64], sizes = [16, 64], strides = [1, 1]} : vector<16x192xf32> to vector<16x64xf32>
    %14 = vector.extract_strided_slice %11 {offsets = [0, 128], sizes = [16, 64], strides = [1, 1]} : vector<16x192xf32> to vector<16x64xf32>
    %cst_12 = arith.constant dense<0.000000e+00> : vector<16x16xf32>
    %15 = tpu.matmul %12, %13, %cst_12 {dimension_numbers = #tpu.dot_dimension_numbers<[1], [1], [0], [0], [0, 0, 1, 0], [], []>} : vector<16x64xf32>, vector<16x64xf32>, vector<16x16xf32> -> vector<16x16xf32>
    %16 = arith.addf %15, %3 : vector<16x16xf32>
    %cst_13 = arith.constant dense<0xFF800000> : vector<16xf32>
    %17 = vector.multi_reduction <maximumf>, %16, %cst_13 [1] : vector<16x16xf32> to vector<16xf32>
    %18 = vector.shape_cast %17 : vector<16xf32> to vector<16x1xf32>
    %19 = vector.broadcast %18 : vector<16x1xf32> to vector<16x16xf32>
    %20 = arith.subf %16, %19 : vector<16x16xf32>
    %21 = math.exp %20 : vector<16x16xf32>
    %cst_14 = arith.constant dense<0.000000e+00> : vector<16xf32>
    %22 = vector.multi_reduction <add>, %21, %cst_14 [1] : vector<16x16xf32> to vector<16xf32>
    %23 = vector.shape_cast %22 : vector<16xf32> to vector<16x1xf32>
    %24 = tpu.reciprocal %23 {approx = true} : vector<16x1xf32> -> vector<16x1xf32>
    %25 = vector.broadcast %24 : vector<16x1xf32> to vector<16x16xf32>
    %26 = arith.mulf %21, %25 : vector<16x16xf32>
    %cst_15 = arith.constant dense<0.000000e+00> : vector<16x64xf32>
    %27 = tpu.matmul %26, %14, %cst_15 {dimension_numbers = #tpu.dot_dimension_numbers<[1], [0], [0], [1], [0, 0, 1, 1], [], []>} : vector<16x16xf32>, vector<16x64xf32>, vector<16x64xf32> -> vector<16x64xf32>
    %c0_16 = arith.constant 0 : index
    %c0_17 = arith.constant 0 : index
    %c0_18 = arith.constant 0 : index
    %28 = vector.load %arg4[%c0_16, %c0_17, %c0_18] : memref<2x64x64xf32, #tpu.memory_space<vmem>>, vector<1x64x64xf32>
    %29 = vector.shape_cast %28 : vector<1x64x64xf32> to vector<64x64xf32>
    %cst_19 = arith.constant dense<0.000000e+00> : vector<16x64xf32>
    %30 = tpu.matmul %27, %29, %cst_19 {dimension_numbers = #tpu.dot_dimension_numbers<[1], [0], [0], [1], [0, 0, 1, 1], [], []>} : vector<16x64xf32>, vector<64x64xf32>, vector<16x64xf32> -> vector<16x64xf32>
    %31 = vector.extract_strided_slice %5 {offsets = [1, 0], sizes = [1, 64], strides = [1, 1]} : vector<8x192xf32> to vector<1x64xf32>
    %32 = vector.broadcast %31 : vector<1x64xf32> to vector<16x64xf32>
    %33 = arith.addf %30, %32 : vector<16x64xf32>
    %34 = arith.addf %2, %33 : vector<16x64xf32>
    %35 = vector.extract_strided_slice %5 {offsets = [4, 0], sizes = [1, 64], strides = [1, 1]} : vector<8x192xf32> to vector<1x64xf32>
    %36 = vector.extract_strided_slice %5 {offsets = [5, 0], sizes = [1, 64], strides = [1, 1]} : vector<8x192xf32> to vector<1x64xf32>
    %cst_20 = arith.constant dense<0.000000e+00> : vector<16xf32>
    %37 = vector.multi_reduction <add>, %34, %cst_20 [1] : vector<16x64xf32> to vector<16xf32>
    %38 = vector.shape_cast %37 : vector<16xf32> to vector<16x1xf32>
    %cst_21 = arith.constant 6.400000e+01 : f32
    %39 = vector.broadcast %cst_21 : f32 to vector<16x1xf32>
    %40 = arith.divf %38, %39 : vector<16x1xf32>
    %41 = vector.broadcast %40 : vector<16x1xf32> to vector<16x64xf32>
    %42 = arith.subf %34, %41 : vector<16x64xf32>
    %43 = arith.mulf %42, %42 : vector<16x64xf32>
    %cst_22 = arith.constant dense<0.000000e+00> : vector<16xf32>
    %44 = vector.multi_reduction <add>, %43, %cst_22 [1] : vector<16x64xf32> to vector<16xf32>
    %45 = vector.shape_cast %44 : vector<16xf32> to vector<16x1xf32>
    %cst_23 = arith.constant 6.400000e+01 : f32
    %46 = vector.broadcast %cst_23 : f32 to vector<16x1xf32>
    %47 = arith.divf %45, %46 : vector<16x1xf32>
    %48 = vector.broadcast %40 : vector<16x1xf32> to vector<16x64xf32>
    %49 = arith.subf %34, %48 : vector<16x64xf32>
    %cst_24 = arith.constant 9.99999974E-6 : f32
    %50 = vector.broadcast %cst_24 : f32 to vector<16x1xf32>
    %51 = arith.addf %47, %50 : vector<16x1xf32>
    %52 = math.rsqrt %51 : vector<16x1xf32>
    %53 = vector.broadcast %52 : vector<16x1xf32> to vector<16x64xf32>
    %54 = arith.mulf %49, %53 : vector<16x64xf32>
    %55 = vector.broadcast %35 : vector<1x64xf32> to vector<16x64xf32>
    %56 = arith.mulf %54, %55 : vector<16x64xf32>
    %57 = vector.broadcast %36 : vector<1x64xf32> to vector<16x64xf32>
    %58 = arith.addf %56, %57 : vector<16x64xf32>
    %c0_25 = arith.constant 0 : index
    %c0_26 = arith.constant 0 : index
    %c0_27 = arith.constant 0 : index
    %59 = vector.load %arg5[%c0_25, %c0_26, %c0_27] : memref<2x64x128xf32, #tpu.memory_space<vmem>>, vector<1x64x128xf32>
    %60 = vector.shape_cast %59 : vector<1x64x128xf32> to vector<64x128xf32>
    %cst_28 = arith.constant dense<0.000000e+00> : vector<16x128xf32>
    %61 = tpu.matmul %58, %60, %cst_28 {dimension_numbers = #tpu.dot_dimension_numbers<[1], [0], [0], [1], [0, 0, 1, 1], [], []>} : vector<16x64xf32>, vector<64x128xf32>, vector<16x128xf32> -> vector<16x128xf32>
    %62 = vector.extract_strided_slice %5 {offsets = [2, 0], sizes = [1, 128], strides = [1, 1]} : vector<8x192xf32> to vector<1x128xf32>
    %63 = vector.broadcast %62 : vector<1x128xf32> to vector<16x128xf32>
    %64 = arith.addf %61, %63 : vector<16x128xf32>
    %cst_29 = arith.constant 0.000000e+00 : f32
    %65 = vector.broadcast %cst_29 : f32 to vector<16x128xf32>
    %66 = arith.maximumf %64, %65 : vector<16x128xf32>
    %c0_30 = arith.constant 0 : index
    %c0_31 = arith.constant 0 : index
    %c0_32 = arith.constant 0 : index
    %67 = vector.load %arg6[%c0_30, %c0_31, %c0_32] : memref<2x128x64xf32, #tpu.memory_space<vmem>>, vector<1x128x64xf32>
    %68 = vector.shape_cast %67 : vector<1x128x64xf32> to vector<128x64xf32>
    %cst_33 = arith.constant dense<0.000000e+00> : vector<16x64xf32>
    %69 = tpu.matmul %66, %68, %cst_33 {dimension_numbers = #tpu.dot_dimension_numbers<[1], [0], [0], [1], [0, 0, 1, 1], [], []>} : vector<16x128xf32>, vector<128x64xf32>, vector<16x64xf32> -> vector<16x64xf32>
    %70 = vector.extract_strided_slice %5 {offsets = [3, 0], sizes = [1, 64], strides = [1, 1]} : vector<8x192xf32> to vector<1x64xf32>
    %71 = vector.broadcast %70 : vector<1x64xf32> to vector<16x64xf32>
    %72 = arith.addf %69, %71 : vector<16x64xf32>
    %73 = arith.addf %58, %72 : vector<16x64xf32>
    %74 = vector.extract_strided_slice %5 {offsets = [6, 0], sizes = [1, 64], strides = [1, 1]} : vector<8x192xf32> to vector<1x64xf32>
    %75 = vector.extract_strided_slice %5 {offsets = [7, 0], sizes = [1, 64], strides = [1, 1]} : vector<8x192xf32> to vector<1x64xf32>
    %cst_34 = arith.constant dense<0.000000e+00> : vector<16xf32>
    %76 = vector.multi_reduction <add>, %73, %cst_34 [1] : vector<16x64xf32> to vector<16xf32>
    %77 = vector.shape_cast %76 : vector<16xf32> to vector<16x1xf32>
    %cst_35 = arith.constant 6.400000e+01 : f32
    %78 = vector.broadcast %cst_35 : f32 to vector<16x1xf32>
    %79 = arith.divf %77, %78 : vector<16x1xf32>
    %80 = vector.broadcast %79 : vector<16x1xf32> to vector<16x64xf32>
    %81 = arith.subf %73, %80 : vector<16x64xf32>
    %82 = arith.mulf %81, %81 : vector<16x64xf32>
    %cst_36 = arith.constant dense<0.000000e+00> : vector<16xf32>
    %83 = vector.multi_reduction <add>, %82, %cst_36 [1] : vector<16x64xf32> to vector<16xf32>
    %84 = vector.shape_cast %83 : vector<16xf32> to vector<16x1xf32>
    %cst_37 = arith.constant 6.400000e+01 : f32
    %85 = vector.broadcast %cst_37 : f32 to vector<16x1xf32>
    %86 = arith.divf %84, %85 : vector<16x1xf32>
    %87 = vector.broadcast %79 : vector<16x1xf32> to vector<16x64xf32>
    %88 = arith.subf %73, %87 : vector<16x64xf32>
    %cst_38 = arith.constant 9.99999974E-6 : f32
    %89 = vector.broadcast %cst_38 : f32 to vector<16x1xf32>
    %90 = arith.addf %86, %89 : vector<16x1xf32>
    %91 = math.rsqrt %90 : vector<16x1xf32>
    %92 = vector.broadcast %91 : vector<16x1xf32> to vector<16x64xf32>
    %93 = arith.mulf %88, %92 : vector<16x64xf32>
    %94 = vector.broadcast %74 : vector<1x64xf32> to vector<16x64xf32>
    %95 = arith.mulf %93, %94 : vector<16x64xf32>
    %96 = vector.broadcast %75 : vector<1x64xf32> to vector<16x64xf32>
    %97 = arith.addf %95, %96 : vector<16x64xf32>
    %c1 = arith.constant 1 : index
    %c0_39 = arith.constant 0 : index
    %c0_40 = arith.constant 0 : index
    %98 = vector.load %arg7[%c1, %c0_39, %c0_40] : memref<2x8x192xf32, #tpu.memory_space<vmem>>, vector<1x8x192xf32>
    %99 = vector.shape_cast %98 : vector<1x8x192xf32> to vector<8x192xf32>
    %c1_41 = arith.constant 1 : index
    %c0_42 = arith.constant 0 : index
    %c0_43 = arith.constant 0 : index
    %100 = vector.load %arg3[%c1_41, %c0_42, %c0_43] : memref<2x64x192xf32, #tpu.memory_space<vmem>>, vector<1x64x192xf32>
    %101 = vector.shape_cast %100 : vector<1x64x192xf32> to vector<64x192xf32>
    %cst_44 = arith.constant dense<0.000000e+00> : vector<16x192xf32>
    %102 = tpu.matmul %97, %101, %cst_44 {dimension_numbers = #tpu.dot_dimension_numbers<[1], [0], [0], [1], [0, 0, 1, 1], [], []>} : vector<16x64xf32>, vector<64x192xf32>, vector<16x192xf32> -> vector<16x192xf32>
    %103 = vector.extract_strided_slice %99 {offsets = [0, 0], sizes = [1, 192], strides = [1, 1]} : vector<8x192xf32> to vector<1x192xf32>
    %104 = vector.broadcast %103 : vector<1x192xf32> to vector<16x192xf32>
    %105 = arith.addf %102, %104 : vector<16x192xf32>
    %106 = vector.extract_strided_slice %105 {offsets = [0, 0], sizes = [16, 64], strides = [1, 1]} : vector<16x192xf32> to vector<16x64xf32>
    %107 = vector.extract_strided_slice %105 {offsets = [0, 64], sizes = [16, 64], strides = [1, 1]} : vector<16x192xf32> to vector<16x64xf32>
    %108 = vector.extract_strided_slice %105 {offsets = [0, 128], sizes = [16, 64], strides = [1, 1]} : vector<16x192xf32> to vector<16x64xf32>
    %cst_45 = arith.constant dense<0.000000e+00> : vector<16x16xf32>
    %109 = tpu.matmul %106, %107, %cst_45 {dimension_numbers = #tpu.dot_dimension_numbers<[1], [1], [0], [0], [0, 0, 1, 0], [], []>} : vector<16x64xf32>, vector<16x64xf32>, vector<16x16xf32> -> vector<16x16xf32>
    %110 = arith.addf %109, %3 : vector<16x16xf32>
    %cst_46 = arith.constant dense<0xFF800000> : vector<16xf32>
    %111 = vector.multi_reduction <maximumf>, %110, %cst_46 [1] : vector<16x16xf32> to vector<16xf32>
    %112 = vector.shape_cast %111 : vector<16xf32> to vector<16x1xf32>
    %113 = vector.broadcast %112 : vector<16x1xf32> to vector<16x16xf32>
    %114 = arith.subf %110, %113 : vector<16x16xf32>
    %115 = math.exp %114 : vector<16x16xf32>
    %cst_47 = arith.constant dense<0.000000e+00> : vector<16xf32>
    %116 = vector.multi_reduction <add>, %115, %cst_47 [1] : vector<16x16xf32> to vector<16xf32>
    %117 = vector.shape_cast %116 : vector<16xf32> to vector<16x1xf32>
    %118 = tpu.reciprocal %117 {approx = true} : vector<16x1xf32> -> vector<16x1xf32>
    %119 = vector.broadcast %118 : vector<16x1xf32> to vector<16x16xf32>
    %120 = arith.mulf %115, %119 : vector<16x16xf32>
    %cst_48 = arith.constant dense<0.000000e+00> : vector<16x64xf32>
    %121 = tpu.matmul %120, %108, %cst_48 {dimension_numbers = #tpu.dot_dimension_numbers<[1], [0], [0], [1], [0, 0, 1, 1], [], []>} : vector<16x16xf32>, vector<16x64xf32>, vector<16x64xf32> -> vector<16x64xf32>
    %c1_49 = arith.constant 1 : index
    %c0_50 = arith.constant 0 : index
    %c0_51 = arith.constant 0 : index
    %122 = vector.load %arg4[%c1_49, %c0_50, %c0_51] : memref<2x64x64xf32, #tpu.memory_space<vmem>>, vector<1x64x64xf32>
    %123 = vector.shape_cast %122 : vector<1x64x64xf32> to vector<64x64xf32>
    %cst_52 = arith.constant dense<0.000000e+00> : vector<16x64xf32>
    %124 = tpu.matmul %121, %123, %cst_52 {dimension_numbers = #tpu.dot_dimension_numbers<[1], [0], [0], [1], [0, 0, 1, 1], [], []>} : vector<16x64xf32>, vector<64x64xf32>, vector<16x64xf32> -> vector<16x64xf32>
    %125 = vector.extract_strided_slice %99 {offsets = [1, 0], sizes = [1, 64], strides = [1, 1]} : vector<8x192xf32> to vector<1x64xf32>
    %126 = vector.broadcast %125 : vector<1x64xf32> to vector<16x64xf32>
    %127 = arith.addf %124, %126 : vector<16x64xf32>
    %128 = arith.addf %97, %127 : vector<16x64xf32>
    %129 = vector.extract_strided_slice %99 {offsets = [4, 0], sizes = [1, 64], strides = [1, 1]} : vector<8x192xf32> to vector<1x64xf32>
    %130 = vector.extract_strided_slice %99 {offsets = [5, 0], sizes = [1, 64], strides = [1, 1]} : vector<8x192xf32> to vector<1x64xf32>
    %cst_53 = arith.constant dense<0.000000e+00> : vector<16xf32>
    %131 = vector.multi_reduction <add>, %128, %cst_53 [1] : vector<16x64xf32> to vector<16xf32>
    %132 = vector.shape_cast %131 : vector<16xf32> to vector<16x1xf32>
    %cst_54 = arith.constant 6.400000e+01 : f32
    %133 = vector.broadcast %cst_54 : f32 to vector<16x1xf32>
    %134 = arith.divf %132, %133 : vector<16x1xf32>
    %135 = vector.broadcast %134 : vector<16x1xf32> to vector<16x64xf32>
    %136 = arith.subf %128, %135 : vector<16x64xf32>
    %137 = arith.mulf %136, %136 : vector<16x64xf32>
    %cst_55 = arith.constant dense<0.000000e+00> : vector<16xf32>
    %138 = vector.multi_reduction <add>, %137, %cst_55 [1] : vector<16x64xf32> to vector<16xf32>
    %139 = vector.shape_cast %138 : vector<16xf32> to vector<16x1xf32>
    %cst_56 = arith.constant 6.400000e+01 : f32
    %140 = vector.broadcast %cst_56 : f32 to vector<16x1xf32>
    %141 = arith.divf %139, %140 : vector<16x1xf32>
    %142 = vector.broadcast %134 : vector<16x1xf32> to vector<16x64xf32>
    %143 = arith.subf %128, %142 : vector<16x64xf32>
    %cst_57 = arith.constant 9.99999974E-6 : f32
    %144 = vector.broadcast %cst_57 : f32 to vector<16x1xf32>
    %145 = arith.addf %141, %144 : vector<16x1xf32>
    %146 = math.rsqrt %145 : vector<16x1xf32>
    %147 = vector.broadcast %146 : vector<16x1xf32> to vector<16x64xf32>
    %148 = arith.mulf %143, %147 : vector<16x64xf32>
    %149 = vector.broadcast %129 : vector<1x64xf32> to vector<16x64xf32>
    %150 = arith.mulf %148, %149 : vector<16x64xf32>
    %151 = vector.broadcast %130 : vector<1x64xf32> to vector<16x64xf32>
    %152 = arith.addf %150, %151 : vector<16x64xf32>
    %c1_58 = arith.constant 1 : index
    %c0_59 = arith.constant 0 : index
    %c0_60 = arith.constant 0 : index
    %153 = vector.load %arg5[%c1_58, %c0_59, %c0_60] : memref<2x64x128xf32, #tpu.memory_space<vmem>>, vector<1x64x128xf32>
    %154 = vector.shape_cast %153 : vector<1x64x128xf32> to vector<64x128xf32>
    %cst_61 = arith.constant dense<0.000000e+00> : vector<16x128xf32>
    %155 = tpu.matmul %152, %154, %cst_61 {dimension_numbers = #tpu.dot_dimension_numbers<[1], [0], [0], [1], [0, 0, 1, 1], [], []>} : vector<16x64xf32>, vector<64x128xf32>, vector<16x128xf32> -> vector<16x128xf32>
    %156 = vector.extract_strided_slice %99 {offsets = [2, 0], sizes = [1, 128], strides = [1, 1]} : vector<8x192xf32> to vector<1x128xf32>
    %157 = vector.broadcast %156 : vector<1x128xf32> to vector<16x128xf32>
    %158 = arith.addf %155, %157 : vector<16x128xf32>
    %cst_62 = arith.constant 0.000000e+00 : f32
    %159 = vector.broadcast %cst_62 : f32 to vector<16x128xf32>
    %160 = arith.maximumf %158, %159 : vector<16x128xf32>
    %c1_63 = arith.constant 1 : index
    %c0_64 = arith.constant 0 : index
    %c0_65 = arith.constant 0 : index
    %161 = vector.load %arg6[%c1_63, %c0_64, %c0_65] : memref<2x128x64xf32, #tpu.memory_space<vmem>>, vector<1x128x64xf32>
    %162 = vector.shape_cast %161 : vector<1x128x64xf32> to vector<128x64xf32>
    %cst_66 = arith.constant dense<0.000000e+00> : vector<16x64xf32>
    %163 = tpu.matmul %160, %162, %cst_66 {dimension_numbers = #tpu.dot_dimension_numbers<[1], [0], [0], [1], [0, 0, 1, 1], [], []>} : vector<16x128xf32>, vector<128x64xf32>, vector<16x64xf32> -> vector<16x64xf32>
    %164 = vector.extract_strided_slice %99 {offsets = [3, 0], sizes = [1, 64], strides = [1, 1]} : vector<8x192xf32> to vector<1x64xf32>
    %165 = vector.broadcast %164 : vector<1x64xf32> to vector<16x64xf32>
    %166 = arith.addf %163, %165 : vector<16x64xf32>
    %167 = arith.addf %152, %166 : vector<16x64xf32>
    %168 = vector.extract_strided_slice %99 {offsets = [6, 0], sizes = [1, 64], strides = [1, 1]} : vector<8x192xf32> to vector<1x64xf32>
    %169 = vector.extract_strided_slice %99 {offsets = [7, 0], sizes = [1, 64], strides = [1, 1]} : vector<8x192xf32> to vector<1x64xf32>
    %cst_67 = arith.constant dense<0.000000e+00> : vector<16xf32>
    %170 = vector.multi_reduction <add>, %167, %cst_67 [1] : vector<16x64xf32> to vector<16xf32>
    %171 = vector.shape_cast %170 : vector<16xf32> to vector<16x1xf32>
    %cst_68 = arith.constant 6.400000e+01 : f32
    %172 = vector.broadcast %cst_68 : f32 to vector<16x1xf32>
    %173 = arith.divf %171, %172 : vector<16x1xf32>
    %174 = vector.broadcast %173 : vector<16x1xf32> to vector<16x64xf32>
    %175 = arith.subf %167, %174 : vector<16x64xf32>
    %176 = arith.mulf %175, %175 : vector<16x64xf32>
    %cst_69 = arith.constant dense<0.000000e+00> : vector<16xf32>
    %177 = vector.multi_reduction <add>, %176, %cst_69 [1] : vector<16x64xf32> to vector<16xf32>
    %178 = vector.shape_cast %177 : vector<16xf32> to vector<16x1xf32>
    %cst_70 = arith.constant 6.400000e+01 : f32
    %179 = vector.broadcast %cst_70 : f32 to vector<16x1xf32>
    %180 = arith.divf %178, %179 : vector<16x1xf32>
    %181 = vector.broadcast %173 : vector<16x1xf32> to vector<16x64xf32>
    %182 = arith.subf %167, %181 : vector<16x64xf32>
    %cst_71 = arith.constant 9.99999974E-6 : f32
    %183 = vector.broadcast %cst_71 : f32 to vector<16x1xf32>
    %184 = arith.addf %180, %183 : vector<16x1xf32>
    %185 = math.rsqrt %184 : vector<16x1xf32>
    %186 = vector.broadcast %185 : vector<16x1xf32> to vector<16x64xf32>
    %187 = arith.mulf %182, %186 : vector<16x64xf32>
    %188 = vector.broadcast %168 : vector<1x64xf32> to vector<16x64xf32>
    %189 = arith.mulf %187, %188 : vector<16x64xf32>
    %190 = vector.broadcast %169 : vector<1x64xf32> to vector<16x64xf32>
    %191 = arith.addf %189, %190 : vector<16x64xf32>
    %c0_72 = arith.constant 0 : index
    %c0_73 = arith.constant 0 : index
    %192 = vector.load %arg8[%c0_72, %c0_73] : memref<128x96xf32, #tpu.memory_space<vmem>>, vector<64x96xf32>
    %c64 = arith.constant 64 : index
    %c0_74 = arith.constant 0 : index
    %193 = vector.load %arg8[%c64, %c0_74] : memref<128x96xf32, #tpu.memory_space<vmem>>, vector<32x96xf32>
    %c96 = arith.constant 96 : index
    %c0_75 = arith.constant 0 : index
    %194 = vector.load %arg8[%c96, %c0_75] : memref<128x96xf32, #tpu.memory_space<vmem>>, vector<32x1xf32>
    %c0_76 = arith.constant 0 : index
    %c0_77 = arith.constant 0 : index
    %195 = vector.load %arg9[%c0_76, %c0_77] : memref<8x96xf32, #tpu.memory_space<vmem>>, vector<8x96xf32>
    %196 = vector.extract_strided_slice %195 {offsets = [0, 0], sizes = [1, 96], strides = [1, 1]} : vector<8x96xf32> to vector<1x96xf32>
    %197 = vector.extract_strided_slice %195 {offsets = [1, 0], sizes = [1, 32], strides = [1, 1]} : vector<8x96xf32> to vector<1x32xf32>
    %198 = vector.extract_strided_slice %195 {offsets = [2, 0], sizes = [1, 1], strides = [1, 1]} : vector<8x96xf32> to vector<1x1xf32>
    %cst_78 = arith.constant dense<0.000000e+00> : vector<16x96xf32>
    %199 = tpu.matmul %191, %192, %cst_78 {dimension_numbers = #tpu.dot_dimension_numbers<[1], [0], [0], [1], [0, 0, 1, 1], [], []>} : vector<16x64xf32>, vector<64x96xf32>, vector<16x96xf32> -> vector<16x96xf32>
    %200 = vector.broadcast %196 : vector<1x96xf32> to vector<16x96xf32>
    %201 = arith.addf %199, %200 : vector<16x96xf32>
    %202 = vector.extract_strided_slice %201 {offsets = [0, 0], sizes = [16, 64], strides = [1, 1]} : vector<16x96xf32> to vector<16x64xf32>
    %203 = vector.extract_strided_slice %201 {offsets = [0, 64], sizes = [16, 32], strides = [1, 1]} : vector<16x96xf32> to vector<16x32xf32>
    %cst_79 = arith.constant 0.000000e+00 : f32
    %204 = vector.broadcast %cst_79 : f32 to vector<2x32xf32>
    %cst_80 = arith.constant dense<0.000000e+00> : vector<2x96xf32>
    %205 = tpu.matmul %204, %193, %cst_80 {dimension_numbers = #tpu.dot_dimension_numbers<[1], [0], [0], [1], [0, 0, 1, 1], [], []>} : vector<2x32xf32>, vector<32x96xf32>, vector<2x96xf32> -> vector<2x96xf32>
    %206 = vector.extract_strided_slice %202 {offsets = [0, 0], sizes = [2, 64], strides = [1, 1]} : vector<16x64xf32> to vector<2x64xf32>
    %207 = vector.extract_strided_slice %205 {offsets = [0, 0], sizes = [2, 64], strides = [1, 1]} : vector<2x96xf32> to vector<2x64xf32>
    %208 = arith.addf %206, %207 : vector<2x64xf32>
    %209 = arith.negf %208 : vector<2x64xf32>
    %210 = math.exp %209 : vector<2x64xf32>
    %cst_81 = arith.constant 1.000000e+00 : f32
    %211 = vector.broadcast %cst_81 : f32 to vector<2x64xf32>
    %212 = arith.addf %211, %210 : vector<2x64xf32>
    %213 = arith.divf %211, %212 : vector<2x64xf32>
    %214 = vector.extract_strided_slice %213 {offsets = [0, 0], sizes = [2, 32], strides = [1, 1]} : vector<2x64xf32> to vector<2x32xf32>
    %215 = vector.extract_strided_slice %213 {offsets = [0, 32], sizes = [2, 32], strides = [1, 1]} : vector<2x64xf32> to vector<2x32xf32>
    %216 = vector.extract_strided_slice %203 {offsets = [0, 0], sizes = [2, 32], strides = [1, 1]} : vector<16x32xf32> to vector<2x32xf32>
    %217 = vector.extract_strided_slice %205 {offsets = [0, 64], sizes = [2, 32], strides = [1, 1]} : vector<2x96xf32> to vector<2x32xf32>
    %218 = vector.broadcast %197 : vector<1x32xf32> to vector<2x32xf32>
    %219 = arith.addf %217, %218 : vector<2x32xf32>
    %220 = arith.mulf %214, %219 : vector<2x32xf32>
    %221 = arith.addf %216, %220 : vector<2x32xf32>
    %222 = math.tanh %221 : vector<2x32xf32>
    %223 = arith.subf %204, %222 : vector<2x32xf32>
    %224 = arith.mulf %215, %223 : vector<2x32xf32>
    %225 = arith.addf %222, %224 : vector<2x32xf32>
    %cst_82 = arith.constant dense<0.000000e+00> : vector<2x96xf32>
    %226 = tpu.matmul %225, %193, %cst_82 {dimension_numbers = #tpu.dot_dimension_numbers<[1], [0], [0], [1], [0, 0, 1, 1], [], []>} : vector<2x32xf32>, vector<32x96xf32>, vector<2x96xf32> -> vector<2x96xf32>
    %227 = vector.extract_strided_slice %202 {offsets = [2, 0], sizes = [2, 64], strides = [1, 1]} : vector<16x64xf32> to vector<2x64xf32>
    %228 = vector.extract_strided_slice %226 {offsets = [0, 0], sizes = [2, 64], strides = [1, 1]} : vector<2x96xf32> to vector<2x64xf32>
    %229 = arith.addf %227, %228 : vector<2x64xf32>
    %230 = arith.negf %229 : vector<2x64xf32>
    %231 = math.exp %230 : vector<2x64xf32>
    %cst_83 = arith.constant 1.000000e+00 : f32
    %232 = vector.broadcast %cst_83 : f32 to vector<2x64xf32>
    %233 = arith.addf %232, %231 : vector<2x64xf32>
    %234 = arith.divf %232, %233 : vector<2x64xf32>
    %235 = vector.extract_strided_slice %234 {offsets = [0, 0], sizes = [2, 32], strides = [1, 1]} : vector<2x64xf32> to vector<2x32xf32>
    %236 = vector.extract_strided_slice %234 {offsets = [0, 32], sizes = [2, 32], strides = [1, 1]} : vector<2x64xf32> to vector<2x32xf32>
    %237 = vector.extract_strided_slice %203 {offsets = [2, 0], sizes = [2, 32], strides = [1, 1]} : vector<16x32xf32> to vector<2x32xf32>
    %238 = vector.extract_strided_slice %226 {offsets = [0, 64], sizes = [2, 32], strides = [1, 1]} : vector<2x96xf32> to vector<2x32xf32>
    %239 = vector.broadcast %197 : vector<1x32xf32> to vector<2x32xf32>
    %240 = arith.addf %238, %239 : vector<2x32xf32>
    %241 = arith.mulf %235, %240 : vector<2x32xf32>
    %242 = arith.addf %237, %241 : vector<2x32xf32>
    %243 = math.tanh %242 : vector<2x32xf32>
    %244 = arith.subf %225, %243 : vector<2x32xf32>
    %245 = arith.mulf %236, %244 : vector<2x32xf32>
    %246 = arith.addf %243, %245 : vector<2x32xf32>
    %cst_84 = arith.constant dense<0.000000e+00> : vector<2x96xf32>
    %247 = tpu.matmul %246, %193, %cst_84 {dimension_numbers = #tpu.dot_dimension_numbers<[1], [0], [0], [1], [0, 0, 1, 1], [], []>} : vector<2x32xf32>, vector<32x96xf32>, vector<2x96xf32> -> vector<2x96xf32>
    %248 = vector.extract_strided_slice %202 {offsets = [4, 0], sizes = [2, 64], strides = [1, 1]} : vector<16x64xf32> to vector<2x64xf32>
    %249 = vector.extract_strided_slice %247 {offsets = [0, 0], sizes = [2, 64], strides = [1, 1]} : vector<2x96xf32> to vector<2x64xf32>
    %250 = arith.addf %248, %249 : vector<2x64xf32>
    %251 = arith.negf %250 : vector<2x64xf32>
    %252 = math.exp %251 : vector<2x64xf32>
    %cst_85 = arith.constant 1.000000e+00 : f32
    %253 = vector.broadcast %cst_85 : f32 to vector<2x64xf32>
    %254 = arith.addf %253, %252 : vector<2x64xf32>
    %255 = arith.divf %253, %254 : vector<2x64xf32>
    %256 = vector.extract_strided_slice %255 {offsets = [0, 0], sizes = [2, 32], strides = [1, 1]} : vector<2x64xf32> to vector<2x32xf32>
    %257 = vector.extract_strided_slice %255 {offsets = [0, 32], sizes = [2, 32], strides = [1, 1]} : vector<2x64xf32> to vector<2x32xf32>
    %258 = vector.extract_strided_slice %203 {offsets = [4, 0], sizes = [2, 32], strides = [1, 1]} : vector<16x32xf32> to vector<2x32xf32>
    %259 = vector.extract_strided_slice %247 {offsets = [0, 64], sizes = [2, 32], strides = [1, 1]} : vector<2x96xf32> to vector<2x32xf32>
    %260 = vector.broadcast %197 : vector<1x32xf32> to vector<2x32xf32>
    %261 = arith.addf %259, %260 : vector<2x32xf32>
    %262 = arith.mulf %256, %261 : vector<2x32xf32>
    %263 = arith.addf %258, %262 : vector<2x32xf32>
    %264 = math.tanh %263 : vector<2x32xf32>
    %265 = arith.subf %246, %264 : vector<2x32xf32>
    %266 = arith.mulf %257, %265 : vector<2x32xf32>
    %267 = arith.addf %264, %266 : vector<2x32xf32>
    %cst_86 = arith.constant dense<0.000000e+00> : vector<2x96xf32>
    %268 = tpu.matmul %267, %193, %cst_86 {dimension_numbers = #tpu.dot_dimension_numbers<[1], [0], [0], [1], [0, 0, 1, 1], [], []>} : vector<2x32xf32>, vector<32x96xf32>, vector<2x96xf32> -> vector<2x96xf32>
    %269 = vector.extract_strided_slice %202 {offsets = [6, 0], sizes = [2, 64], strides = [1, 1]} : vector<16x64xf32> to vector<2x64xf32>
    %270 = vector.extract_strided_slice %268 {offsets = [0, 0], sizes = [2, 64], strides = [1, 1]} : vector<2x96xf32> to vector<2x64xf32>
    %271 = arith.addf %269, %270 : vector<2x64xf32>
    %272 = arith.negf %271 : vector<2x64xf32>
    %273 = math.exp %272 : vector<2x64xf32>
    %cst_87 = arith.constant 1.000000e+00 : f32
    %274 = vector.broadcast %cst_87 : f32 to vector<2x64xf32>
    %275 = arith.addf %274, %273 : vector<2x64xf32>
    %276 = arith.divf %274, %275 : vector<2x64xf32>
    %277 = vector.extract_strided_slice %276 {offsets = [0, 0], sizes = [2, 32], strides = [1, 1]} : vector<2x64xf32> to vector<2x32xf32>
    %278 = vector.extract_strided_slice %276 {offsets = [0, 32], sizes = [2, 32], strides = [1, 1]} : vector<2x64xf32> to vector<2x32xf32>
    %279 = vector.extract_strided_slice %203 {offsets = [6, 0], sizes = [2, 32], strides = [1, 1]} : vector<16x32xf32> to vector<2x32xf32>
    %280 = vector.extract_strided_slice %268 {offsets = [0, 64], sizes = [2, 32], strides = [1, 1]} : vector<2x96xf32> to vector<2x32xf32>
    %281 = vector.broadcast %197 : vector<1x32xf32> to vector<2x32xf32>
    %282 = arith.addf %280, %281 : vector<2x32xf32>
    %283 = arith.mulf %277, %282 : vector<2x32xf32>
    %284 = arith.addf %279, %283 : vector<2x32xf32>
    %285 = math.tanh %284 : vector<2x32xf32>
    %286 = arith.subf %267, %285 : vector<2x32xf32>
    %287 = arith.mulf %278, %286 : vector<2x32xf32>
    %288 = arith.addf %285, %287 : vector<2x32xf32>
    %cst_88 = arith.constant dense<0.000000e+00> : vector<2x96xf32>
    %289 = tpu.matmul %288, %193, %cst_88 {dimension_numbers = #tpu.dot_dimension_numbers<[1], [0], [0], [1], [0, 0, 1, 1], [], []>} : vector<2x32xf32>, vector<32x96xf32>, vector<2x96xf32> -> vector<2x96xf32>
    %290 = vector.extract_strided_slice %202 {offsets = [8, 0], sizes = [2, 64], strides = [1, 1]} : vector<16x64xf32> to vector<2x64xf32>
    %291 = vector.extract_strided_slice %289 {offsets = [0, 0], sizes = [2, 64], strides = [1, 1]} : vector<2x96xf32> to vector<2x64xf32>
    %292 = arith.addf %290, %291 : vector<2x64xf32>
    %293 = arith.negf %292 : vector<2x64xf32>
    %294 = math.exp %293 : vector<2x64xf32>
    %cst_89 = arith.constant 1.000000e+00 : f32
    %295 = vector.broadcast %cst_89 : f32 to vector<2x64xf32>
    %296 = arith.addf %295, %294 : vector<2x64xf32>
    %297 = arith.divf %295, %296 : vector<2x64xf32>
    %298 = vector.extract_strided_slice %297 {offsets = [0, 0], sizes = [2, 32], strides = [1, 1]} : vector<2x64xf32> to vector<2x32xf32>
    %299 = vector.extract_strided_slice %297 {offsets = [0, 32], sizes = [2, 32], strides = [1, 1]} : vector<2x64xf32> to vector<2x32xf32>
    %300 = vector.extract_strided_slice %203 {offsets = [8, 0], sizes = [2, 32], strides = [1, 1]} : vector<16x32xf32> to vector<2x32xf32>
    %301 = vector.extract_strided_slice %289 {offsets = [0, 64], sizes = [2, 32], strides = [1, 1]} : vector<2x96xf32> to vector<2x32xf32>
    %302 = vector.broadcast %197 : vector<1x32xf32> to vector<2x32xf32>
    %303 = arith.addf %301, %302 : vector<2x32xf32>
    %304 = arith.mulf %298, %303 : vector<2x32xf32>
    %305 = arith.addf %300, %304 : vector<2x32xf32>
    %306 = math.tanh %305 : vector<2x32xf32>
    %307 = arith.subf %288, %306 : vector<2x32xf32>
    %308 = arith.mulf %299, %307 : vector<2x32xf32>
    %309 = arith.addf %306, %308 : vector<2x32xf32>
    %cst_90 = arith.constant dense<0.000000e+00> : vector<2x96xf32>
    %310 = tpu.matmul %309, %193, %cst_90 {dimension_numbers = #tpu.dot_dimension_numbers<[1], [0], [0], [1], [0, 0, 1, 1], [], []>} : vector<2x32xf32>, vector<32x96xf32>, vector<2x96xf32> -> vector<2x96xf32>
    %311 = vector.extract_strided_slice %202 {offsets = [10, 0], sizes = [2, 64], strides = [1, 1]} : vector<16x64xf32> to vector<2x64xf32>
    %312 = vector.extract_strided_slice %310 {offsets = [0, 0], sizes = [2, 64], strides = [1, 1]} : vector<2x96xf32> to vector<2x64xf32>
    %313 = arith.addf %311, %312 : vector<2x64xf32>
    %314 = arith.negf %313 : vector<2x64xf32>
    %315 = math.exp %314 : vector<2x64xf32>
    %cst_91 = arith.constant 1.000000e+00 : f32
    %316 = vector.broadcast %cst_91 : f32 to vector<2x64xf32>
    %317 = arith.addf %316, %315 : vector<2x64xf32>
    %318 = arith.divf %316, %317 : vector<2x64xf32>
    %319 = vector.extract_strided_slice %318 {offsets = [0, 0], sizes = [2, 32], strides = [1, 1]} : vector<2x64xf32> to vector<2x32xf32>
    %320 = vector.extract_strided_slice %318 {offsets = [0, 32], sizes = [2, 32], strides = [1, 1]} : vector<2x64xf32> to vector<2x32xf32>
    %321 = vector.extract_strided_slice %203 {offsets = [10, 0], sizes = [2, 32], strides = [1, 1]} : vector<16x32xf32> to vector<2x32xf32>
    %322 = vector.extract_strided_slice %310 {offsets = [0, 64], sizes = [2, 32], strides = [1, 1]} : vector<2x96xf32> to vector<2x32xf32>
    %323 = vector.broadcast %197 : vector<1x32xf32> to vector<2x32xf32>
    %324 = arith.addf %322, %323 : vector<2x32xf32>
    %325 = arith.mulf %319, %324 : vector<2x32xf32>
    %326 = arith.addf %321, %325 : vector<2x32xf32>
    %327 = math.tanh %326 : vector<2x32xf32>
    %328 = arith.subf %309, %327 : vector<2x32xf32>
    %329 = arith.mulf %320, %328 : vector<2x32xf32>
    %330 = arith.addf %327, %329 : vector<2x32xf32>
    %cst_92 = arith.constant dense<0.000000e+00> : vector<2x96xf32>
    %331 = tpu.matmul %330, %193, %cst_92 {dimension_numbers = #tpu.dot_dimension_numbers<[1], [0], [0], [1], [0, 0, 1, 1], [], []>} : vector<2x32xf32>, vector<32x96xf32>, vector<2x96xf32> -> vector<2x96xf32>
    %332 = vector.extract_strided_slice %202 {offsets = [12, 0], sizes = [2, 64], strides = [1, 1]} : vector<16x64xf32> to vector<2x64xf32>
    %333 = vector.extract_strided_slice %331 {offsets = [0, 0], sizes = [2, 64], strides = [1, 1]} : vector<2x96xf32> to vector<2x64xf32>
    %334 = arith.addf %332, %333 : vector<2x64xf32>
    %335 = arith.negf %334 : vector<2x64xf32>
    %336 = math.exp %335 : vector<2x64xf32>
    %cst_93 = arith.constant 1.000000e+00 : f32
    %337 = vector.broadcast %cst_93 : f32 to vector<2x64xf32>
    %338 = arith.addf %337, %336 : vector<2x64xf32>
    %339 = arith.divf %337, %338 : vector<2x64xf32>
    %340 = vector.extract_strided_slice %339 {offsets = [0, 0], sizes = [2, 32], strides = [1, 1]} : vector<2x64xf32> to vector<2x32xf32>
    %341 = vector.extract_strided_slice %339 {offsets = [0, 32], sizes = [2, 32], strides = [1, 1]} : vector<2x64xf32> to vector<2x32xf32>
    %342 = vector.extract_strided_slice %203 {offsets = [12, 0], sizes = [2, 32], strides = [1, 1]} : vector<16x32xf32> to vector<2x32xf32>
    %343 = vector.extract_strided_slice %331 {offsets = [0, 64], sizes = [2, 32], strides = [1, 1]} : vector<2x96xf32> to vector<2x32xf32>
    %344 = vector.broadcast %197 : vector<1x32xf32> to vector<2x32xf32>
    %345 = arith.addf %343, %344 : vector<2x32xf32>
    %346 = arith.mulf %340, %345 : vector<2x32xf32>
    %347 = arith.addf %342, %346 : vector<2x32xf32>
    %348 = math.tanh %347 : vector<2x32xf32>
    %349 = arith.subf %330, %348 : vector<2x32xf32>
    %350 = arith.mulf %341, %349 : vector<2x32xf32>
    %351 = arith.addf %348, %350 : vector<2x32xf32>
    %cst_94 = arith.constant dense<0.000000e+00> : vector<2x96xf32>
    %352 = tpu.matmul %351, %193, %cst_94 {dimension_numbers = #tpu.dot_dimension_numbers<[1], [0], [0], [1], [0, 0, 1, 1], [], []>} : vector<2x32xf32>, vector<32x96xf32>, vector<2x96xf32> -> vector<2x96xf32>
    %353 = vector.extract_strided_slice %202 {offsets = [14, 0], sizes = [2, 64], strides = [1, 1]} : vector<16x64xf32> to vector<2x64xf32>
    %354 = vector.extract_strided_slice %352 {offsets = [0, 0], sizes = [2, 64], strides = [1, 1]} : vector<2x96xf32> to vector<2x64xf32>
    %355 = arith.addf %353, %354 : vector<2x64xf32>
    %356 = arith.negf %355 : vector<2x64xf32>
    %357 = math.exp %356 : vector<2x64xf32>
    %cst_95 = arith.constant 1.000000e+00 : f32
    %358 = vector.broadcast %cst_95 : f32 to vector<2x64xf32>
    %359 = arith.addf %358, %357 : vector<2x64xf32>
    %360 = arith.divf %358, %359 : vector<2x64xf32>
    %361 = vector.extract_strided_slice %360 {offsets = [0, 0], sizes = [2, 32], strides = [1, 1]} : vector<2x64xf32> to vector<2x32xf32>
    %362 = vector.extract_strided_slice %360 {offsets = [0, 32], sizes = [2, 32], strides = [1, 1]} : vector<2x64xf32> to vector<2x32xf32>
    %363 = vector.extract_strided_slice %203 {offsets = [14, 0], sizes = [2, 32], strides = [1, 1]} : vector<16x32xf32> to vector<2x32xf32>
    %364 = vector.extract_strided_slice %352 {offsets = [0, 64], sizes = [2, 32], strides = [1, 1]} : vector<2x96xf32> to vector<2x32xf32>
    %365 = vector.broadcast %197 : vector<1x32xf32> to vector<2x32xf32>
    %366 = arith.addf %364, %365 : vector<2x32xf32>
    %367 = arith.mulf %361, %366 : vector<2x32xf32>
    %368 = arith.addf %363, %367 : vector<2x32xf32>
    %369 = math.tanh %368 : vector<2x32xf32>
    %370 = arith.subf %351, %369 : vector<2x32xf32>
    %371 = arith.mulf %362, %370 : vector<2x32xf32>
    %372 = arith.addf %369, %371 : vector<2x32xf32>
    %cst_96 = arith.constant dense<0.000000e+00> : vector<2x1xf32>
    %373 = tpu.matmul %372, %194, %cst_96 {dimension_numbers = #tpu.dot_dimension_numbers<[1], [0], [0], [1], [0, 0, 1, 1], [], []>} : vector<2x32xf32>, vector<32x1xf32>, vector<2x1xf32> -> vector<2x1xf32>
    %374 = vector.broadcast %198 : vector<1x1xf32> to vector<2x1xf32>
    %375 = arith.addf %373, %374 : vector<2x1xf32>
    %c0_97 = arith.constant 0 : index
    %c0_98 = arith.constant 0 : index
    %376 = vector.load %arg10[%c0_97, %c0_98] : memref<2x1xf32, #tpu.memory_space<vmem>>, vector<2x1xf32>
    tpu.vector_store %arg10[%c0_97, %c0_98], %375 {strides = array<i32>} : memref<2x1xf32, #tpu.memory_space<vmem>>, vector<2x1xf32>,
    return
  }
}

</mosaic_0001>

<bundles_post_ra>
// kernel: net_forward.1
= control target key start
LH: loop header
LB: loop body
LE: loop exit
PB: predicated region body
PF: predicated region fallthrough
CT: control target
= control target key end

     0   :  { %vm54_vm0 = vcmask 1044480   ;;  %vm47_vm1 = vcmask 629760   ;;  %v3217_v28 = vmov 0.0   ;;  %vm161_vm2 = vcmask 523264   ;;  %s3218_s11 = smov 64   ;;  %s4037_s2 = inlined_call_operand.vmem [shape: f32[77,64], index: 2, kind: input, shape index: {}]   ;;  %s4038_s0 = inlined_call_operand.vmem [shape: f32[16,77], index: 0, kind: input, shape index: {}]   ;;  %s4039_s3 = inlined_call_operand.vmem [shape: f32[2,64,192], index: 3, kind: input, shape index: {}]   ;;  %s4040_s7 = inlined_call_operand.vmem [shape: f32[2,8,192], index: 7, kind: input, shape index: {}]   ;;  %s4041_s1 = inlined_call_operand.vmem [shape: f32[16,16], index: 1, kind: input, shape index: {}]   ;;  %s4042_s4 = inlined_call_operand.vmem [shape: f32[2,64,64], index: 4, kind: input, shape index: {}]   ;;  %s4043_s5 = inlined_call_operand.vmem [shape: f32[2,64,128], index: 5, kind: input, shape index: {}]   ;;  %s4044_s6 = inlined_call_operand.vmem [shape: f32[2,128,64], index: 6, kind: input, shape index: {}]   ;;  %s4045_s8 = inlined_call_operand.vmem [shape: f32[128,96], index: 8, kind: input, shape index: {}]   ;;  %s4046_s9 = inlined_call_operand.vmem [shape: f32[8,96], index: 9, kind: input, shape index: {}]   ;;  %s4047_s10 = inlined_call_operand.vmem [shape: f32[2,1], index: 10, kind: output, shape index: {}]  }
   0x1   :  { %v46_v0 = vld [vmem:[%s4037_s2 + $0x48] sm:$0x1f]  ;;  %v45_v1 = vld [vmem:[%s4037_s2 + $0x40] sm:$0xff]  ;;  %v44_v2 = vld [vmem:[%s4037_s2 + $0x38] sm:$0xff]  ;;  %232 = vmatprep.mubr.f32.mxu1 %v3217_v28  ;;  %v153_v31 = vlaneseq  ;;  %vm334_vm3 = vcmask 130048   ;;  %vm3219_vm4 = vmmov 0  }
   0x2   :  { %2817 = vmatprep.subr.msk.mxu0 %vm54_vm0, %v46_v0  ;;  %v43_v3 = vld [vmem:[%s4037_s2 + $0x30] sm:$0xff]  ;;  %v35_v4 = vld [vmem:[%s4038_s0] sm:$0xff]  ;;  %v152_v5 = vld [vmem:[%s4039_s3 + $0x78] sm:$0xff]  ;;  %vm1573_vm5 = vcmask 261120   ;;  %vm2557_vm6 = vcmask 1024  }
   0x3   :  { %2818 = vmatpush3.msk.msra.mxu0 %vm54_vm0, %v46_v0  ;;  %2837 = vmatprep.mubr.msk.f32.mxu0 %vm47_vm1, %v35_v4  ;;  %v151_v6 = vld [vmem:[%s4039_s3 + $0x70] sm:$0xff]  ;;  %v150_v7 = vld [vmem:[%s4039_s3 + $0x68] sm:$0xff]  ;;  %v149_v8 = vld [vmem:[%s4039_s3 + $0x60] sm:$0xff]  ;;  %v3373_v32 = vshrl.u32 %v153_v31, 7 }
   0x4   :  { %2819 = vmatprep.subr.mxu0 %v45_v1  ;;  %184 = vmatprep.subr.mxu1 %v152_v5  ;;  %v42_v9 = vld [vmem:[%s4037_s2 + $0x28] sm:$0xff]  ;;  %v148_v10 = vld [vmem:[%s4039_s3 + $0x58] sm:$0xff]  ;;  %v147_v11 = vld [vmem:[%s4039_s3 + $0x50] sm:$0xff] }
   0x5   :  { %2820 = vmatpush3.msra.mxu0 %v45_v1  ;;  %185 = vmatpush1.msra.mxu1 %v151_v6  ;;  %v41_v12 = vld [vmem:[%s4037_s2 + $0x20] sm:$0xff]  ;;  %v146_v13 = vld [vmem:[%s4039_s3 + $0x48] sm:$0xff]  ;;  %v40_v15 = vld [vmem:[%s4037_s2 + $0x18] sm:$0xff]  ;;  %v3376_v33 = vsub.s32 0, %v3373_v32 }
   0x6   :  { %2821 = vmatprep.subr.mxu0 %v44_v2  ;;  %186 = vmatprep.subr.mxu1 %v150_v7  ;;  %v145_v14 = vld [vmem:[%s4039_s3 + $0x40] sm:$0xff]  ;;  %v144_v16 = vld [vmem:[%s4039_s3 + $0x38] sm:$0xff]  ;;  %v143_v17 = vld [vmem:[%s4039_s3 + $0x30] sm:$0xff] }
   0x7   :  { %2822 = vmatpush3.msra.mxu0 %v44_v2  ;;  %187 = vmatpush1.msra.mxu1 %v149_v8  ;;  %v39_v18 = vld [vmem:[%s4037_s2 + $0x10] sm:$0xff]  ;;  %v142_v19 = vld [vmem:[%s4039_s3 + $0x28] sm:$0xff]  ;;  %v141_v20 = vld [vmem:[%s4039_s3 + $0x20] sm:$0xff] }
   0x8   :  { %2823 = vmatprep.subr.mxu0 %v43_v3  ;;  %188 = vmatprep.subr.mxu1 %v148_v10  ;;  %v38_v21 = vld [vmem:[%s4037_s2 + $0x8] sm:$0xff]  ;;  %v140_v22 = vld [vmem:[%s4039_s3 + $0x18] sm:$0xff]  ;;  %v37_v23 = vld [vmem:[%s4037_s2] sm:$0xff] }
   0x9   :  { %2824 = vmatpush3.msra.mxu0 %v43_v3  ;;  %189 = vmatpush1.msra.mxu1 %v147_v11  ;;  %v36_v24 = vld [vmem:[%s4038_s0 + $0x8] sm:$0xff]  ;;  %v139_v25 = vld [vmem:[%s4039_s3 + $0x10] sm:$0xff]  ;;  %v137_v27 = vld [vmem:[%s4039_s3] sm:$0xff] }
   0xa   :  { %2825 = vmatprep.subr.mxu0 %v42_v9  ;;  %190 = vmatprep.subr.mxu1 %v146_v13  ;;  %v138_v26 = vld [vmem:[%s4039_s3 + $0x8] sm:$0xff]  ;;  %v3381_v34 = vld [vmem:[%s4040_s7] sm:$0xff]  ;;  %v445_v2 = vld [vmem:[%s4042_s4 + $0x38] sm:$0xff] }
   0xb   :  { %2826 = vmatpush3.msra.mxu0 %v42_v9  ;;  %191 = vmatpush1.msra.mxu1 %v145_v14  ;;  %v156_v35 = vrot.slane %v3381_v34, %v3376_v33  ;;  %v136_v38 = vld [vmem:[%s4040_s7 + $0x8] sm:$0xff]  ;;  %v3400_v49 = vld [vmem:[%s4041_s1] sm:$0xff]  ;;  %v444_v9 = vld [vmem:[%s4042_s4 + $0x30] sm:$0xff] }
   0xc   :  { %2827 = vmatprep.subr.mxu0 %v41_v12  ;;  %192 = vmatprep.subr.mxu1 %v144_v16  ;;  %v160_v41 = vrot.slane %v136_v38, %v3376_v33  ;;  %v3405_v50 = vld [vmem:[%s4041_s1 + $0x8] sm:$0xff]  ;;  %v442_v11 = vld [vmem:[%s4042_s4 + $0x20] sm:$0xff]  ;;  %v440_v13 = vld [vmem:[%s4042_s4 + $0x10] sm:$0xff]  ;;  %s3221_s1 = smov 32  }
   0xd   :  { %2828 = vmatpush3.msra.mxu0 %v41_v12  ;;  %193 = vmatpush1.msra.mxu1 %v143_v17  ;;  %v443_v10 = vld [vmem:[%s4042_s4 + $0x28] sm:$0xff]  ;;  %v441_v12 = vld [vmem:[%s4042_s4 + $0x18] sm:$0xff] }
   0xe   :  { %2829 = vmatprep.subr.mxu0 %v40_v15  ;;  %194 = vmatprep.subr.mxu1 %v142_v19  ;;  %v439_v14 = vld [vmem:[%s4042_s4 + $0x8] sm:$0xff] }
   0xf   :  { %2830 = vmatpush3.msra.mxu0 %v40_v15  ;;  %195 = vmatpush1.msra.mxu1 %v141_v20  ;;  %v438_v15 = vld [vmem:[%s4042_s4] sm:$0xff] }
  0x10   :  { %2831 = vmatprep.subr.mxu0 %v39_v18  ;;  %196 = vmatprep.subr.mxu1 %v140_v22 }
  0x11   :  { %2832 = vmatpush3.msra.mxu0 %v39_v18  ;;  %197 = vmatpush1.msra.mxu1 %v139_v25  ;;  %v3442_v18 = vsub.s32 1, %v3373_v32 }
  0x12   :  { %2833 = vmatprep.subr.mxu0 %v38_v21  ;;  %198 = vmatprep.subr.mxu1 %v138_v26 }
  0x13   :  { %2834 = vmatpush3.msra.mxu0 %v38_v21  ;;  %199 = vmatpush1.msra.mxu1 %v137_v27  ;;  %v449_v19 = vrot.slane %v3381_v34, %v3442_v18 }
  0x14   :  { %2835 = vmatprep.subr.mxu0 %v37_v23 }
  0x15   :  { %2836 = vmatpush3.msra.mxu0 %v37_v23 }
  0x16   :  { %2838 = vmatmul.mubr.msk.f32.vlgmr.msra.gmra.mxu0 %vm47_vm1, %v36_v24 }
  0xd6   :  { %v3364_v29 = vpop.f32.mrf.mxu0 }
  0xd8   :  { %v3366_v30 = vpop.f32.mrf.mxu0 }
  0xd9   :  { %2566 = vmatmul.mubr.msk.f32.vlgmr.msra.gmra.mxu1 %vm161_vm2, %v3366_v30 }
  0xda   :  { %238 = vmatprep.mubr.f32.mxu1 %v3217_v28 }
  0xdd   :  { %2567 = vmatmul.mubr.msk.f32.gmra.mxu1 %vm161_vm2, %v3364_v29 }
 0x199   :  { %v234_v36 = vpop.f32.mrf.mxu1 }
 0x19a   :  { %v235_v37 = vadd.f32 %v234_v36, %v156_v35 }
 0x19b   :  { %v236_v39 = vpop.f32.mrf.mxu1 }
 0x19c   :  { %2844 = vmatprep.mubr.msk.f32.mxu1 %vm161_vm2, %v235_v37  ;;  %v237_v45 = vadd.f32 %v236_v39, %v160_v41 }
 0x19d   :  { %v240_v40 = vpop.f32.mrf.mxu1 }
 0x19e   :  { %v241_v42 = vadd.f32 %v240_v40, %v156_v35 }
 0x19f   :  { %v242_v43 = vpop.f32.mrf.mxu1 }
 0x1a0   :  { %v243_v44 = vadd.f32 %v242_v43, %v160_v41  ;;  %249 = vrot.lane.b32.xlu0 %v241_v42, %s3218_s11  ;;  %v578_v43 = vld [vmem:[%s4043_s5 + $0x30] sm:$0xff] }
 0x1a2   :  { %2847 = vmatprep.subr.mxu0 %v243_v44 }
 0x1a3   :  { %2848 = vmatpush3.msra.mxu0 %v243_v44  ;;  %v577_v44 = vld [vmem:[%s4043_s5 + $0x28] sm:$0xff] }
 0x1a4   :  { %2849 = vmatprep.subr.mxu0 %v237_v45  ;;  %247 = vrot.lane.b32.xlu0 %v235_v37, %s3218_s11 }
 0x1a5   :  { %2850 = vmatpush3.msra.mxu0 %v237_v45  ;;  %v576_v45 = vld [vmem:[%s4043_s5 + $0x20] sm:$0xff] }
 0x1a6   :  { %2854 = vmatprep.subr.mxu0 %v445_v2 }
 0x212   :  { %v250_v46 = vpop.permute.xlu0 %249 }
 0x213   :  { %2840 = vmatprep.subr.msk.mxu1 %vm161_vm2, %v250_v46 }
 0x214   :  { %2841 = vmatpush3.xpose.msk.msra.mxu1 %vm161_vm2, %v250_v46  ;;  %v575_v46 = vld [vmem:[%s4043_s5 + $0x18] sm:$0xff] }
 0x216   :  { %v248_v47 = vpop.permute.xlu0 %247 }
 0x217   :  { %2842 = vmatprep.subr.msk.mxu1 %vm161_vm2, %v248_v47 }
 0x218   :  { %2843 = vmatpush3.xpose.msk.msra.mxu1 %vm161_vm2, %v248_v47  ;;  %v574_v47 = vld [vmem:[%s4043_s5 + $0x10] sm:$0xff] }
 0x21b   :  { %2845 = vmatmul.mubr.msk.f32.vlgmr.msra.gmra.mxu1 %vm161_vm2, %v241_v42  ;;  %v579_v42 = vld [vmem:[%s4043_s5 + $0x38] sm:$0xff] }
 0x21c   :  { %2873 = vmatprep.subr.mxu1 %v579_v42 }
 0x21d   :  { %2874 = vmatpush3.msra.mxu1 %v579_v42 }
 0x21e   :  { %2875 = vmatprep.subr.mxu1 %v578_v43 }
 0x21f   :  { %2876 = vmatpush3.msra.mxu1 %v578_v43 }
 0x220   :  { %2877 = vmatprep.subr.mxu1 %v577_v44 }
 0x221   :  { %2878 = vmatpush3.msra.mxu1 %v577_v44 }
 0x222   :  { %2879 = vmatprep.subr.mxu1 %v576_v45 }
 0x223   :  { %2880 = vmatpush3.msra.mxu1 %v576_v45 }
 0x224   :  { %2881 = vmatprep.subr.mxu1 %v575_v46 }
 0x225   :  { %2882 = vmatpush3.msra.mxu1 %v575_v46 }
 0x226   :  { %2883 = vmatprep.subr.mxu1 %v574_v47 }
 0x227   :  { %2884 = vmatpush3.msra.mxu1 %v574_v47 }
 0x2db   :  { %v2846_v48 = vpop.f32.mrf.mxu1 }
 0x2dc   :  { %v331_v53 = vadd.f32 %v2846_v48, %v3405_v50  ;;  %v573_v48 = vld [vmem:[%s4043_s5 + $0x8] sm:$0xff] }
 0x2dd   :  { %v325_v51 = vpop.f32.mrf.mxu1  ;;  %2885 = vmatprep.subr.mxu1 %v573_v48 }
 0x2de   :  { %v326_v52 = vadd.f32 %v325_v51, %v3400_v49  ;;  %v338_v55 = vsel %vm334_vm3, %v331_v53, -inf  ;;  %2886 = vmatpush3.msra.mxu1 %v573_v48  ;;  %v572_v51 = vld [vmem:[%s4043_s5] sm:$0xff] }
 0x2df   :  { %2887 = vmatprep.subr.mxu1 %v572_v51 }
 0x2e0   :  { %v335_v54 = vsel %vm334_vm3, %v326_v52, -inf  ;;  %2888 = vmatpush3.msra.mxu1 %v572_v51 }
 0x2e1   :  { %336 = vmax.xlane.f32.xlu1 %v335_v54  ;;  %v680_v54 = vld [vmem:[%s4044_s6 + $0x68] sm:$0xff] }
 0x2e5   :  { %339 = vmax.xlane.f32.xlu1 %v338_v55  ;;  %v679_v55 = vld [vmem:[%s4044_s6 + $0x60] sm:$0xff] }
 0x36a   :  { %v337_v56 = vpop.xlane.xlu1 %336 }
 0x36b   :  { %v341_v57 = vsub.f32 %v326_v52, %v337_v56  ;;  %v682_v52 = vld [vmem:[%s4044_s6 + $0x78] sm:$0xff] }
 0x36c   :  { %v678_v56 = vld [vmem:[%s4044_s6 + $0x58] sm:$0xff] }
 0x36d   :  { %v343_v58 = vmul.f32 1.442695, %v341_v57  ;;  %v677_v57 = vld [vmem:[%s4044_s6 + $0x50] sm:$0xff] }
 0x36e   :  { %v340_v59 = vpop.xlane.xlu1 %339 }
 0x36f   :  { %3137 = vpow2.f32 %v343_v58  ;;  %v342_v60 = vsub.f32 %v331_v53, %v340_v59  ;;  %v681_v53 = vld [vmem:[%s4044_s6 + $0x70] sm:$0xff]  ;;  %v676_v58 = vld [vmem:[%s4044_s6 + $0x48] sm:$0xff]  ;;  %v675_v59 = vld [vmem:[%s4044_s6 + $0x40] sm:$0xff] }
 0x371   :  { %v345_v61 = vmul.f32 1.442695, %v342_v60  ;;  %v674_v60 = vld [vmem:[%s4044_s6 + $0x38] sm:$0xff] }
 0x373   :  { %3139 = vpow2.f32 %v345_v61  ;;  %v673_v61 = vld [vmem:[%s4044_s6 + $0x30] sm:$0xff] }
 0x37c   :  { %v3138_v62 = vpop.eup %3137 }
 0x37d   :  { %v347_v63 = vsel %vm334_vm3, %v3138_v62, 0.0 }
 0x37e   :  { %348 = vadd.xlane.f32.xlu0 %v347_v63  ;;  %v671_v63 = vld [vmem:[%s4044_s6 + $0x20] sm:$0xff] }
 0x380   :  { %v3140_v0 = vpop.eup %3139 }
 0x381   :  { %v350_v1 = vsel %vm334_vm3, %v3140_v0, 0.0 }
 0x382   :  { %351 = vadd.xlane.f32.xlu1 %v350_v1 }
 0x407   :  { %v349_v3 = vpop.xlane.xlu0 %348 }
 0x408   :  { %3141 = vrcp.f32 %v349_v3 }
 0x40b   :  { %v352_v4 = vpop.xlane.xlu1 %351 }
 0x40c   :  { %3143 = vrcp.f32 %v352_v4 }
 0x415   :  { %v3142_v5 = vpop.eup %3141 }
 0x416   :  { %v355_v6 = vmul.f32 %v3142_v5, %v3138_v62  ;;  %v672_v62 = vld [vmem:[%s4044_s6 + $0x28] sm:$0xff] }
 0x418   :  { %2851 = vmatprep.mubr.msk.f32.mxu0 %vm334_vm3, %v355_v6  ;;  %v562_v6 = vsub.s32 4, %v3373_v32 }
 0x419   :  { %v3144_v7 = vpop.eup %3143 }
 0x41a   :  { %v356_v8 = vmul.f32 %v3144_v7, %v3140_v0  ;;  %v568_v7 = vsub.s32 5, %v3373_v32 }
 0x41c   :  { %2852 = vmatmul.mubr.msk.f32.vlgmr.msra.gmra.mxu0 %vm334_vm3, %v356_v8  ;;  %v563_v8 = vrot.slane %v3381_v34, %v562_v6 }
 0x41d   :  { %2855 = vmatpush3.msra.mxu0 %v445_v2 }
 0x41e   :  { %2856 = vmatprep.subr.mxu0 %v444_v9 }
 0x41f   :  { %2857 = vmatpush3.msra.mxu0 %v444_v9 }
 0x420   :  { %2858 = vmatprep.subr.mxu0 %v443_v10 }
 0x421   :  { %2859 = vmatpush3.msra.mxu0 %v443_v10 }
 0x422   :  { %2860 = vmatprep.subr.mxu0 %v442_v11 }
 0x423   :  { %2861 = vmatpush3.msra.mxu0 %v442_v11  ;;  %v569_v11 = vrot.slane %v3381_v34, %v568_v7 }
 0x424   :  { %2862 = vmatprep.subr.mxu0 %v441_v12 }
 0x425   :  { %2863 = vmatpush3.msra.mxu0 %v441_v12 }
 0x426   :  { %2864 = vmatprep.subr.mxu0 %v440_v13 }
 0x427   :  { %2865 = vmatpush3.msra.mxu0 %v440_v13 }
 0x428   :  { %2866 = vmatprep.subr.mxu0 %v439_v14 }
 0x429   :  { %2867 = vmatpush3.msra.mxu0 %v439_v14 }
 0x42a   :  { %2868 = vmatprep.subr.mxu0 %v438_v15 }
 0x42b   :  { %2869 = vmatpush3.msra.mxu0 %v438_v15 }
 0x42c   :  { %2892 = vmatprep.subr.mxu0 %v682_v52 }
 0x4dc   :  { %v2853_v16 = vpop.f32.mrf.mxu0 }
 0x4de   :  { %v429_v17 = vpop.f32.mrf.mxu0 }
 0x4df   :  { %2870 = vmatprep.mubr.msk.f32.mxu0 %vm161_vm2, %v429_v17 }
 0x4e0   :  { %2871 = vmatmul.mubr.msk.f32.vlgmr.msra.gmra.mxu0 %vm161_vm2, %v2853_v16 }
 0x4e1   :  { %2893 = vmatpush3.msra.mxu0 %v682_v52 }
 0x4e2   :  { %2894 = vmatprep.subr.mxu0 %v681_v53 }
 0x4e3   :  { %2895 = vmatpush3.msra.mxu0 %v681_v53 }
 0x4e4   :  { %2896 = vmatprep.subr.mxu0 %v680_v54 }
 0x4e5   :  { %2897 = vmatpush3.msra.mxu0 %v680_v54 }
 0x4e6   :  { %2898 = vmatprep.subr.mxu0 %v679_v55 }
 0x4e7   :  { %2899 = vmatpush3.msra.mxu0 %v679_v55 }
 0x4e8   :  { %2900 = vmatprep.subr.mxu0 %v678_v56 }
 0x4e9   :  { %2901 = vmatpush3.msra.mxu0 %v678_v56 }
 0x4ea   :  { %2902 = vmatprep.subr.mxu0 %v677_v57 }
 0x4eb   :  { %2903 = vmatpush3.msra.mxu0 %v677_v57  ;;  %v2595_v57 = vld [vmem:[%s4039_s3 + $0xf8] sm:$0xff] }
 0x4ec   :  { %2904 = vmatprep.subr.mxu0 %v676_v58  ;;  %852 = vmatprep.subr.mxu1 %v2595_v57 }
 0x4ed   :  { %2905 = vmatpush3.msra.mxu0 %v676_v58  ;;  %v2594_v58 = vld [vmem:[%s4039_s3 + $0xf0] sm:$0xff] }
 0x4ee   :  { %2906 = vmatprep.subr.mxu0 %v675_v59 }
 0x4ef   :  { %2907 = vmatpush3.msra.mxu0 %v675_v59  ;;  %v2593_v59 = vld [vmem:[%s4039_s3 + $0xe8] sm:$0xff] }
 0x4f0   :  { %2908 = vmatprep.subr.mxu0 %v674_v60 }
 0x4f1   :  { %2909 = vmatpush3.msra.mxu0 %v674_v60  ;;  %v2592_v60 = vld [vmem:[%s4039_s3 + $0xe0] sm:$0xff] }
 0x4f2   :  { %2910 = vmatprep.subr.mxu0 %v673_v61 }
 0x4f3   :  { %2911 = vmatpush3.msra.mxu0 %v673_v61  ;;  %v2591_v61 = vld [vmem:[%s4039_s3 + $0xd8] sm:$0xff] }
 0x4f4   :  { %2912 = vmatprep.subr.mxu0 %v672_v62 }
 0x4f5   :  { %2913 = vmatpush3.msra.mxu0 %v672_v62  ;;  %v2590_v62 = vld [vmem:[%s4039_s3 + $0xd0] sm:$0xff] }
 0x4f6   :  { %2914 = vmatprep.subr.mxu0 %v671_v63 }
 0x4f7   :  { %2915 = vmatpush3.msra.mxu0 %v671_v63  ;;  %v2589_v63 = vld [vmem:[%s4039_s3 + $0xc8] sm:$0xff] }
 0x5a0   :  { %v2872_v20 = vpop.f32.mrf.mxu0 }
 0x5a1   :  { %v528_v22 = vadd.f32 %v2872_v20, %v449_v19  ;;  %v669_v20 = vld [vmem:[%s4044_s6 + $0x10] sm:$0xff] }
 0x5a2   :  { %v522_v21 = vpop.f32.mrf.mxu0 }
 0x5a3   :  { %v523_v23 = vadd.f32 %v522_v21, %v449_v19  ;;  %v532_v26 = vadd.f32 %v3364_v29, %v528_v22  ;;  %v670_v19 = vld [vmem:[%s4044_s6 + $0x18] sm:$0xff]  ;;  %v668_v21 = vld [vmem:[%s4044_s6 + $0x8] sm:$0xff]  ;;  %v667_v22 = vld [vmem:[%s4044_s6] sm:$0xff] }
 0x5a4   :  { %2916 = vmatprep.subr.mxu0 %v670_v19 }
 0x5a5   :  { %v531_v24 = vadd.f32 %v523_v23, %v3366_v30  ;;  %v536_v27 = vsel %vm161_vm2, %v532_v26, 0.0  ;;  %2917 = vmatpush3.msra.mxu0 %v670_v19  ;;  %v3546_v23 = vsub.s32 2, %v3373_v32  ;;  %v798_v19 = vsub.s32 7, %v3373_v32 }
 0x5a6   :  { %2918 = vmatprep.subr.mxu0 %v669_v20 }
 0x5a7   :  { %v533_v25 = vsel %vm161_vm2, %v531_v24, 0.0  ;;  %2919 = vmatpush3.msra.mxu0 %v669_v20 }
 0x5a8   :  { %534 = vadd.xlane.f32.xlu1 %v533_v25  ;;  %2920 = vmatprep.subr.mxu0 %v668_v21 }
 0x5a9   :  { %2921 = vmatpush3.msra.mxu0 %v668_v21 }
 0x5aa   :  { %2922 = vmatprep.subr.mxu0 %v667_v22 }
 0x5ab   :  { %2923 = vmatpush3.msra.mxu0 %v667_v22 }
 0x5ac   :  { %537 = vadd.xlane.f32.xlu1 %v536_v27 }
 0x631   :  { %v535_v31 = vpop.xlane.xlu1 %534 }
 0x632   :  { %v540_v35 = vmul.f32 0.015625, %v535_v31 }
 0x634   :  { %v3450_v36 = vsub.f32 %v531_v24, %v540_v35  ;;  %v583_v24 = vrot.slane %v3381_v34, %v3546_v23 }
 0x635   :  { %v538_v37 = vpop.xlane.xlu1 %537 }
 0x636   :  { %v541_v38 = vmul.f32 0.015625, %v538_v37  ;;  %v544_v39 = vmul.f32 %v3450_v36, %v3450_v36  ;;  %v685_v37 = vsub.s32 3, %v3373_v32 }
 0x638   :  { %v3454_v40 = vsub.f32 %v532_v26, %v541_v38  ;;  %v546_v30 = vsel %vm161_vm2, %v544_v39, 0.0  ;;  %v686_v38 = vrot.slane %v3381_v34, %v685_v37 }
 0x639   :  { %547 = vadd.xlane.f32.xlu1 %v546_v30 }
 0x63a   :  { %v545_v29 = vmul.f32 %v3454_v40, %v3454_v40 }
 0x63c   :  { %v549_v41 = vsel %vm161_vm2, %v545_v29, 0.0 }
 0x63d   :  { %550 = vadd.xlane.f32.xlu1 %v549_v41 }
 0x6c2   :  { %v548_v0 = vpop.xlane.xlu1 %547 }
 0x6c3   :  { %v552_v1 = vmul.f32 0.015625, %v548_v0  ;;  %v2588_v0 = vld [vmem:[%s4039_s3 + $0xc0] sm:$0xff] }
 0x6c5   :  { %v554_v2 = vadd.f32 1e-05, %v552_v1  ;;  %v2587_v1 = vld [vmem:[%s4039_s3 + $0xb8] sm:$0xff] }
 0x6c6   :  { %v551_v3 = vpop.xlane.xlu1 %550 }
 0x6c7   :  { %3145 = vrsqrt.f32 %v554_v2  ;;  %v553_v4 = vmul.f32 0.015625, %v551_v3  ;;  %v2586_v2 = vld [vmem:[%s4039_s3 + $0xb0] sm:$0xff]  ;;  %v2585_v3 = vld [vmem:[%s4039_s3 + $0xa8] sm:$0xff] }
 0x6c9   :  { %v555_v5 = vadd.f32 1e-05, %v553_v4  ;;  %v2584_v4 = vld [vmem:[%s4039_s3 + $0xa0] sm:$0xff] }
 0x6cb   :  { %3147 = vrsqrt.f32 %v555_v5  ;;  %v2583_v5 = vld [vmem:[%s4039_s3 + $0x98] sm:$0xff] }
 0x6d4   :  { %v3146_v9 = vpop.eup %3145 }
 0x6d5   :  { %v558_v10 = vmul.f32 %v3146_v9, %v3450_v36  ;;  %v2581_v9 = vld [vmem:[%s4039_s3 + $0x88] sm:$0xff] }
 0x6d7   :  { %v564_v12 = vmul.f32 %v563_v8, %v558_v10  ;;  %v2580_v10 = vld [vmem:[%s4039_s3 + $0x80] sm:$0xff] }
 0x6d8   :  { %v3148_v13 = vpop.eup %3147 }
 0x6d9   :  { %v559_v14 = vmul.f32 %v3148_v13, %v3454_v40  ;;  %v570_v15 = vadd.f32 %v569_v11, %v564_v12 }
 0x6db   :  { %v565_v16 = vmul.f32 %v563_v8, %v559_v14  ;;  %2889 = vmatprep.mubr.msk.f32.mxu1 %vm161_vm2, %v570_v15  ;;  %v2582_v8 = vld [vmem:[%s4039_s3 + $0x90] sm:$0xff] }
 0x6dd   :  { %v571_v17 = vadd.f32 %v569_v11, %v565_v16 }
 0x6df   :  { %2890 = vmatmul.mubr.msk.f32.vlgmr.msra.gmra.mxu1 %vm161_vm2, %v571_v17 }
 0x6e0   :  { %900 = vmatprep.mubr.f32.mxu1 %v3217_v28  ;;  %853 = vmatpush1.msra.mxu1 %v2594_v58 }
 0x6e1   :  { %854 = vmatprep.subr.mxu1 %v2593_v59 }
 0x6e2   :  { %855 = vmatpush1.msra.mxu1 %v2592_v60 }
 0x6e3   :  { %856 = vmatprep.subr.mxu1 %v2591_v61 }
 0x6e4   :  { %857 = vmatpush1.msra.mxu1 %v2590_v62 }
 0x6e5   :  { %858 = vmatprep.subr.mxu1 %v2589_v63 }
 0x6e6   :  { %859 = vmatpush1.msra.mxu1 %v2588_v0 }
 0x6e7   :  { %860 = vmatprep.subr.mxu1 %v2587_v1  ;;  %v2611_v1 = vld [vmem:[%s4042_s4 + $0x78] sm:$0xff] }
 0x6e8   :  { %861 = vmatpush1.msra.mxu1 %v2586_v2 }
 0x6e9   :  { %862 = vmatprep.subr.mxu1 %v2585_v3 }
 0x6ea   :  { %863 = vmatpush1.msra.mxu1 %v2584_v4 }
 0x6eb   :  { %864 = vmatprep.subr.mxu1 %v2583_v5 }
 0x6ec   :  { %865 = vmatpush1.msra.mxu1 %v2582_v8 }
 0x6ed   :  { %866 = vmatprep.subr.mxu1 %v2581_v9 }
 0x6ee   :  { %867 = vmatpush1.msra.mxu1 %v2580_v10  ;;  %v2610_v10 = vld [vmem:[%s4042_s4 + $0x70] sm:$0xff] }
 0x79f   :  { %v2891_v25 = vpop.f32.mrf.mxu1 }
 0x7a0   :  { %v662_v26 = vadd.f32 %v2891_v25, %v583_v24 }
 0x7a1   :  { %v656_v27 = vpop.f32.mrf.mxu1 }
 0x7a2   :  { %v657_v31 = vadd.f32 %v656_v27, %v583_v24  ;;  %v666_v36 = vmax.f32 %v662_v26, 0.0  ;;  %v799_v24 = vrot.slane %v3381_v34, %v798_v19 }
 0x7a4   :  { %v665_v35 = vmax.f32 %v657_v31, 0.0 }
 0x7a6   :  { %2924 = vmatprep.mubr.f32.mxu0 %v665_v35 }
 0x7a7   :  { %2925 = vmatmul.mubr.f32.vlgmr.msra.gmra.mxu0 %v666_v36 }
 0x867   :  { %v2926_v39 = vpop.f32.mrf.mxu0 }
 0x868   :  { %v759_v30 = vadd.f32 %v2926_v39, %v686_v38 }
 0x869   :  { %v753_v40 = vpop.f32.mrf.mxu0 }
 0x86a   :  { %v754_v29 = vadd.f32 %v753_v40, %v686_v38  ;;  %v763_v43 = vadd.f32 %v759_v30, %v571_v17  ;;  %v792_v17 = vsub.s32 6, %v3373_v32 }
 0x86c   :  { %v762_v41 = vadd.f32 %v754_v29, %v570_v15  ;;  %v767_v44 = vsel %vm161_vm2, %v763_v43, 0.0  ;;  %v793_v20 = vrot.slane %v3381_v34, %v792_v17  ;;  %v3626_v34 = vld [vmem:[%s4040_s7 + $0x10] sm:$0xff] }
 0x86d   :  { %v825_v38 = vrot.slane %v3626_v34, %v3376_v33 }
 0x86e   :  { %v764_v42 = vsel %vm161_vm2, %v762_v41, 0.0 }
 0x86f   :  { %765 = vadd.xlane.f32.xlu1 %v764_v42  ;;  %v2579_v42 = vld [vmem:[%s4040_s7 + $0x18] sm:$0xff] }
 0x873   :  { %768 = vadd.xlane.f32.xlu1 %v767_v44 }
 0x8f8   :  { %v766_v45 = vpop.xlane.xlu1 %765 }
 0x8f9   :  { %v770_v46 = vmul.f32 0.015625, %v766_v45 }
 0x8fb   :  { %v772_v47 = vsub.f32 %v762_v41, %v770_v46  ;;  %v829_v46 = vrot.slane %v2579_v42, %v3376_v33 }
 0x8fc   :  { %v769_v48 = vpop.xlane.xlu1 %768 }
 0x8fd   :  { %v771_v51 = vmul.f32 0.015625, %v769_v48  ;;  %v774_v52 = vmul.f32 %v772_v47, %v772_v47 }
 0x8ff   :  { %v773_v53 = vsub.f32 %v763_v43, %v771_v51  ;;  %v776_v54 = vsel %vm161_vm2, %v774_v52, 0.0 }
 0x900   :  { %777 = vadd.xlane.f32.xlu1 %v776_v54 }
 0x901   :  { %v775_v55 = vmul.f32 %v773_v53, %v773_v53 }
 0x903   :  { %v779_v56 = vsel %vm161_vm2, %v775_v55, 0.0 }
 0x904   :  { %780 = vadd.xlane.f32.xlu0 %v779_v56 }
 0x989   :  { %v778_v11 = vpop.xlane.xlu1 %777 }
 0x98a   :  { %v782_v12 = vmul.f32 0.015625, %v778_v11  ;;  %v2609_v11 = vld [vmem:[%s4042_s4 + $0x68] sm:$0xff] }
 0x98c   :  { %v784_v13 = vadd.f32 1e-05, %v782_v12  ;;  %v2608_v12 = vld [vmem:[%s4042_s4 + $0x60] sm:$0xff] }
 0x98d   :  { %v781_v14 = vpop.xlane.xlu0 %780 }
 0x98e   :  { %3149 = vrsqrt.f32 %v784_v13  ;;  %v783_v15 = vmul.f32 0.015625, %v781_v14  ;;  %v2607_v13 = vld [vmem:[%s4042_s4 + $0x58] sm:$0xff]  ;;  %v2606_v14 = vld [vmem:[%s4042_s4 + $0x50] sm:$0xff] }
 0x990   :  { %v785_v16 = vadd.f32 1e-05, %v783_v15  ;;  %v2605_v15 = vld [vmem:[%s4042_s4 + $0x48] sm:$0xff] }
 0x992   :  { %3151 = vrsqrt.f32 %v785_v16  ;;  %v2604_v16 = vld [vmem:[%s4042_s4 + $0x40] sm:$0xff] }
 0x99b   :  { %v3150_v21 = vpop.eup %3149 }
 0x99c   :  { %v788_v22 = vmul.f32 %v3150_v21, %v772_v47 }
 0x99e   :  { %v794_v25 = vmul.f32 %v793_v20, %v788_v22  ;;  %v1117_v22 = vrot.slane %v3626_v34, %v3442_v18 }
 0x99f   :  { %v3152_v26 = vpop.eup %3151 }
 0x9a0   :  { %v3614_v27 = vadd.f32 %v799_v24, %v794_v25  ;;  %v789_v31 = vmul.f32 %v3152_v26, %v773_v53 }
 0x9a2   :  { %2596 = vmatmul.mubr.msk.f32.vlgmr.msra.gmra.mxu1 %vm161_vm2, %v3614_v27  ;;  %v795_v35 = vmul.f32 %v793_v20, %v789_v31 }
 0x9a3   :  { %906 = vmatprep.mubr.f32.mxu1 %v3217_v28 }
 0x9a4   :  { %v3619_v36 = vadd.f32 %v799_v24, %v795_v35 }
 0x9a6   :  { %2597 = vmatmul.mubr.msk.f32.gmra.mxu1 %vm161_vm2, %v3619_v36 }
 0xa62   :  { %v902_v39 = vpop.f32.mrf.mxu1 }
 0xa63   :  { %v903_v40 = vadd.f32 %v902_v39, %v825_v38 }
 0xa64   :  { %v904_v30 = vpop.f32.mrf.mxu1 }
 0xa65   :  { %915 = vrot.lane.b32.xlu0 %v903_v40, %s3218_s11  ;;  %2931 = vmatprep.mubr.msk.f32.mxu1 %vm161_vm2, %v903_v40  ;;  %v905_v48 = vadd.f32 %v904_v30, %v829_v46 }
 0xa66   :  { %v908_v29 = vpop.f32.mrf.mxu1 }
 0xa67   :  { %v909_v41 = vadd.f32 %v908_v29, %v825_v38 }
 0xa68   :  { %v910_v44 = vpop.f32.mrf.mxu1 }
 0xa69   :  { %917 = vrot.lane.b32.xlu1 %v909_v41, %s3218_s11  ;;  %v911_v47 = vadd.f32 %v910_v44, %v829_v46 }
 0xad7   :  { %v916_v45 = vpop.permute.xlu0 %915 }
 0xadb   :  { %v918_v43 = vpop.permute.xlu1 %917 }
 0xadc   :  { %2927 = vmatprep.subr.msk.mxu1 %vm161_vm2, %v918_v43 }
 0xadd   :  { %2928 = vmatpush3.xpose.msk.msra.mxu1 %vm161_vm2, %v918_v43 }
 0xade   :  { %2929 = vmatprep.subr.msk.mxu1 %vm161_vm2, %v916_v45 }
 0xae1   :  { %2930 = vmatpush3.xpose.msk.msra.mxu1 %vm161_vm2, %v916_v45 }
 0xae2   :  { %2934 = vmatprep.subr.mxu1 %v911_v47 }
 0xae4   :  { %2932 = vmatmul.mubr.msk.f32.vlgmr.msra.gmra.mxu1 %vm161_vm2, %v909_v41 }
 0xae5   :  { %2935 = vmatpush3.msra.mxu1 %v911_v47  ;;  %v2621_v47 = vld [vmem:[%s4043_s5 + $0x78] sm:$0xff] }
 0xae6   :  { %2936 = vmatprep.subr.mxu1 %v905_v48  ;;  %2960 = vmatprep.subr.mxu0 %v2621_v47 }
 0xae7   :  { %2937 = vmatpush3.msra.mxu1 %v905_v48  ;;  %v2620_v48 = vld [vmem:[%s4043_s5 + $0x70] sm:$0xff]  ;;  %2961 = vmatpush3.msra.mxu0 %v2621_v47 }
 0xae8   :  { %2941 = vmatprep.subr.mxu1 %v2611_v1  ;;  %2962 = vmatprep.subr.mxu0 %v2620_v48 }
 0xae9   :  { %2963 = vmatpush3.msra.mxu0 %v2620_v48 }
 0xba4   :  { %v2933_v51 = vpop.f32.mrf.mxu1 }
 0xba5   :  { %v999_v52 = vadd.f32 %v2933_v51, %v3405_v50  ;;  %v2619_v51 = vld [vmem:[%s4043_s5 + $0x68] sm:$0xff] }
 0xba6   :  { %v993_v53 = vpop.f32.mrf.mxu1  ;;  %2964 = vmatprep.subr.mxu0 %v2619_v51 }
 0xba7   :  { %v994_v54 = vadd.f32 %v993_v53, %v3400_v49  ;;  %v1005_v55 = vsel %vm334_vm3, %v999_v52, -inf  ;;  %2965 = vmatpush3.msra.mxu0 %v2619_v51  ;;  %v2617_v53 = vld [vmem:[%s4043_s5 + $0x58] sm:$0xff] }
 0xba8   :  { %1006 = vmax.xlane.f32.xlu0 %v1005_v55  ;;  %v2615_v55 = vld [vmem:[%s4043_s5 + $0x48] sm:$0xff] }
 0xba9   :  { %v1002_v56 = vsel %vm334_vm3, %v994_v54, -inf }
 0xbaa   :  { %1003 = vmax.xlane.f32.xlu1 %v1002_v56  ;;  %v2614_v56 = vld [vmem:[%s4043_s5 + $0x40] sm:$0xff] }
 0xc31   :  { %v1007_v57 = vpop.xlane.xlu0 %1006 }
 0xc32   :  { %v1009_v58 = vsub.f32 %v999_v52, %v1007_v57  ;;  %v2618_v52 = vld [vmem:[%s4043_s5 + $0x60] sm:$0xff]  ;;  %v2639_v57 = vld [vmem:[%s4044_s6 + $0xf8] sm:$0xff] }
 0xc33   :  { %v1004_v59 = vpop.xlane.xlu1 %1003  ;;  %2966 = vmatprep.subr.mxu0 %v2618_v52 }
 0xc34   :  { %v1012_v60 = vmul.f32 1.442695, %v1009_v58  ;;  %v1008_v61 = vsub.f32 %v994_v54, %v1004_v59  ;;  %2967 = vmatpush3.msra.mxu0 %v2618_v52  ;;  %v2616_v54 = vld [vmem:[%s4043_s5 + $0x50] sm:$0xff]  ;;  %v2637_v59 = vld [vmem:[%s4044_s6 + $0xe8] sm:$0xff] }
 0xc35   :  { %2968 = vmatprep.subr.mxu0 %v2617_v53  ;;  %v2638_v58 = vld [vmem:[%s4044_s6 + $0xf0] sm:$0xff] }
 0xc36   :  { %3153 = vpow2.f32 %v1012_v60  ;;  %v1010_v62 = vmul.f32 1.442695, %v1008_v61  ;;  %2969 = vmatpush3.msra.mxu0 %v2617_v53  ;;  %v2636_v60 = vld [vmem:[%s4044_s6 + $0xe0] sm:$0xff]  ;;  %v2635_v61 = vld [vmem:[%s4044_s6 + $0xd8] sm:$0xff] }
 0xc37   :  { %2970 = vmatprep.subr.mxu0 %v2616_v54 }
 0xc38   :  { %3155 = vpow2.f32 %v1010_v62  ;;  %2971 = vmatpush3.msra.mxu0 %v2616_v54  ;;  %v2634_v62 = vld [vmem:[%s4044_s6 + $0xd0] sm:$0xff] }
 0xc39   :  { %2972 = vmatprep.subr.mxu0 %v2615_v55 }
 0xc3a   :  { %2973 = vmatpush3.msra.mxu0 %v2615_v55 }
 0xc3b   :  { %2974 = vmatprep.subr.mxu0 %v2614_v56 }
 0xc3c   :  { %2975 = vmatpush3.msra.mxu0 %v2614_v56 }
 0xc43   :  { %v3154_v63 = vpop.eup %3153 }
 0xc44   :  { %v1017_v50 = vsel %vm334_vm3, %v3154_v63, 0.0 }
 0xc45   :  { %v3156_v0 = vpop.eup %3155  ;;  %1018 = vadd.xlane.f32.xlu0 %v1017_v50  ;;  %v2632_v50 = vld [vmem:[%s4044_s6 + $0xc0] sm:$0xff] }
 0xc46   :  { %v1014_v49 = vsel %vm334_vm3, %v3156_v0, 0.0 }
 0xc47   :  { %1015 = vadd.xlane.f32.xlu1 %v1014_v49  ;;  %v2630_v49 = vld [vmem:[%s4044_s6 + $0xb0] sm:$0xff] }
 0xcce   :  { %v1019_v2 = vpop.xlane.xlu0 %1018 }
 0xccf   :  { %3157 = vrcp.f32 %v1019_v2  ;;  %v2628_v2 = vld [vmem:[%s4044_s6 + $0xa0] sm:$0xff] }
 0xcd0   :  { %v1016_v3 = vpop.xlane.xlu1 %1015 }
 0xcd1   :  { %3159 = vrcp.f32 %v1016_v3 }
 0xcdc   :  { %v3158_v4 = vpop.eup %3157 }
 0xcdd   :  { %v1023_v9 = vmul.f32 %v3158_v4, %v3154_v63  ;;  %v2633_v63 = vld [vmem:[%s4044_s6 + $0xc8] sm:$0xff] }
 0xcde   :  { %v3160_v5 = vpop.eup %3159 }
 0xcdf   :  { %v1022_v8 = vmul.f32 %v3160_v5, %v3156_v0  ;;  %v2631_v0 = vld [vmem:[%s4044_s6 + $0xb8] sm:$0xff] }
 0xce1   :  { %2938 = vmatprep.mubr.msk.f32.mxu1 %vm334_vm3, %v1022_v8 }
 0xce2   :  { %2939 = vmatmul.mubr.msk.f32.vlgmr.msra.gmra.mxu1 %vm334_vm3, %v1023_v9 }
 0xce3   :  { %2942 = vmatpush3.msra.mxu1 %v2611_v1  ;;  %v2629_v1 = vld [vmem:[%s4044_s6 + $0xa8] sm:$0xff] }
 0xce4   :  { %2943 = vmatprep.subr.mxu1 %v2610_v10 }
 0xce5   :  { %2944 = vmatpush3.msra.mxu1 %v2610_v10 }
 0xce6   :  { %2945 = vmatprep.subr.mxu1 %v2609_v11 }
 0xce7   :  { %2946 = vmatpush3.msra.mxu1 %v2609_v11 }
 0xce8   :  { %2947 = vmatprep.subr.mxu1 %v2608_v12 }
 0xce9   :  { %2948 = vmatpush3.msra.mxu1 %v2608_v12  ;;  %v1230_v12 = vrot.slane %v3626_v34, %v562_v6  ;;  %v2627_v6 = vld [vmem:[%s4044_s6 + $0x98] sm:$0xff] }
 0xcea   :  { %2949 = vmatprep.subr.mxu1 %v2607_v13 }
 0xceb   :  { %2950 = vmatpush3.msra.mxu1 %v2607_v13 }
 0xcec   :  { %2951 = vmatprep.subr.mxu1 %v2606_v14 }
 0xced   :  { %2952 = vmatpush3.msra.mxu1 %v2606_v14 }
 0xcee   :  { %2953 = vmatprep.subr.mxu1 %v2605_v15 }
 0xcef   :  { %2954 = vmatpush3.msra.mxu1 %v2605_v15 }
 0xcf0   :  { %2955 = vmatprep.subr.mxu1 %v2604_v16 }
 0xcf1   :  { %2956 = vmatpush3.msra.mxu1 %v2604_v16 }
 0xcf2   :  { %2979 = vmatprep.subr.mxu1 %v2639_v57 }
 0xda2   :  { %v2940_v20 = vpop.f32.mrf.mxu1 }
 0xda4   :  { %v1096_v21 = vpop.f32.mrf.mxu1 }
 0xda5   :  { %2957 = vmatprep.mubr.msk.f32.mxu1 %vm161_vm2, %v1096_v21 }
 0xda6   :  { %2958 = vmatmul.mubr.msk.f32.vlgmr.msra.gmra.mxu1 %vm161_vm2, %v2940_v20  ;;  %v1236_v20 = vrot.slane %v3626_v34, %v568_v7  ;;  %v2625_v7 = vld [vmem:[%s4044_s6 + $0x88] sm:$0xff] }
 0xda7   :  { %2980 = vmatpush3.msra.mxu1 %v2639_v57 }
 0xda8   :  { %2981 = vmatprep.subr.mxu1 %v2638_v58 }
 0xda9   :  { %2982 = vmatpush3.msra.mxu1 %v2638_v58 }
 0xdaa   :  { %2983 = vmatprep.subr.mxu1 %v2637_v59 }
 0xdab   :  { %2984 = vmatpush3.msra.mxu1 %v2637_v59  ;;  %v1478_v59 = vld [vmem:[%s4045_s8 + $0x38] sm:$0xff] }
 0xdac   :  { %2985 = vmatprep.subr.mxu1 %v2636_v60  ;;  %3014 = vmatprep.subr.mxu0 %v1478_v59 }
 0xdad   :  { %2986 = vmatpush3.msra.mxu1 %v2636_v60  ;;  %v1477_v60 = vld [vmem:[%s4045_s8 + $0x30] sm:$0xff] }
 0xdae   :  { %2987 = vmatprep.subr.mxu1 %v2635_v61 }
 0xdaf   :  { %2988 = vmatpush3.msra.mxu1 %v2635_v61  ;;  %v1476_v61 = vld [vmem:[%s4045_s8 + $0x28] sm:$0xff] }
 0xdb0   :  { %2989 = vmatprep.subr.mxu1 %v2634_v62 }
 0xdb1   :  { %2990 = vmatpush3.msra.mxu1 %v2634_v62  ;;  %v1475_v62 = vld [vmem:[%s4045_s8 + $0x20] sm:$0xff] }
 0xdb2   :  { %2991 = vmatprep.subr.mxu1 %v2633_v63 }
 0xdb3   :  { %2992 = vmatpush3.msra.mxu1 %v2633_v63  ;;  %v1474_v63 = vld [vmem:[%s4045_s8 + $0x18] sm:$0xff] }
 0xdb4   :  { %2993 = vmatprep.subr.mxu1 %v2632_v50 }
 0xdb5   :  { %2994 = vmatpush3.msra.mxu1 %v2632_v50  ;;  %v1473_v50 = vld [vmem:[%s4045_s8 + $0x10] sm:$0xff] }
 0xdb6   :  { %2995 = vmatprep.subr.mxu1 %v2631_v0 }
 0xdb7   :  { %2996 = vmatpush3.msra.mxu1 %v2631_v0  ;;  %v1472_v0 = vld [vmem:[%s4045_s8 + $0x8] sm:$0xff] }
 0xdb8   :  { %2997 = vmatprep.subr.mxu1 %v2630_v49 }
 0xdb9   :  { %2998 = vmatpush3.msra.mxu1 %v2630_v49  ;;  %v1471_v49 = vld [vmem:[%s4045_s8] sm:$0xff] }
 0xdba   :  { %2999 = vmatprep.subr.mxu1 %v2629_v1 }
 0xdbb   :  { %3000 = vmatpush3.msra.mxu1 %v2629_v1  ;;  %v3820_v1 = vld [vmem:[%s4045_s8 + $0x58] sm:$0xff] }
 0xdbc   :  { %3001 = vmatprep.subr.mxu1 %v2628_v2 }
 0xdbd   :  { %3002 = vmatpush3.msra.mxu1 %v2628_v2  ;;  %v3827_v2 = vld [vmem:[%s4045_s8 + $0x50] sm:$0xff] }
 0xdbe   :  { %3003 = vmatprep.subr.mxu1 %v2627_v6 }
 0xdbf   :  { %3004 = vmatpush3.msra.mxu1 %v2627_v6 }
 0xe66   :  { %v2959_v24 = vpop.f32.mrf.mxu1 }
 0xe67   :  { %v1196_v25 = vadd.f32 %v2959_v24, %v1117_v22 }
 0xe68   :  { %v1190_v26 = vpop.f32.mrf.mxu1 }
 0xe69   :  { %v1191_v31 = vadd.f32 %v1190_v26, %v1117_v22  ;;  %v1200_v35 = vadd.f32 %v1196_v25, %v3619_v36  ;;  %v2626_v25 = vld [vmem:[%s4044_s6 + $0x90] sm:$0xff]  ;;  %v2624_v26 = vld [vmem:[%s4044_s6 + $0x80] sm:$0xff] }
 0xe6a   :  { %3005 = vmatprep.subr.mxu1 %v2626_v25 }
 0xe6b   :  { %v1204_v38 = vsel %vm161_vm2, %v1200_v35, 0.0  ;;  %v1199_v39 = vadd.f32 %v1191_v31, %v3614_v27  ;;  %3006 = vmatpush3.msra.mxu1 %v2626_v25  ;;  %v1251_v31 = vrot.slane %v3626_v34, %v3546_v23 }
 0xe6c   :  { %1205 = vadd.xlane.f32.xlu0 %v1204_v38  ;;  %3007 = vmatprep.subr.mxu1 %v2625_v7 }
 0xe6d   :  { %v1201_v40 = vsel %vm161_vm2, %v1199_v39, 0.0  ;;  %3008 = vmatpush3.msra.mxu1 %v2625_v7 }
 0xe6e   :  { %1202 = vadd.xlane.f32.xlu1 %v1201_v40  ;;  %3009 = vmatprep.subr.mxu1 %v2624_v26 }
 0xe6f   :  { %3010 = vmatpush3.msra.mxu1 %v2624_v26 }
 0xe70   :  { %3055 = vmatprep.subr.mxu1 %v3217_v28 }
 0xef5   :  { %v1206_v30 = vpop.xlane.xlu0 %1205 }
 0xef6   :  { %v1208_v29 = vmul.f32 0.015625, %v1206_v30 }
 0xef7   :  { %v1203_v41 = vpop.xlane.xlu1 %1202 }
 0xef8   :  { %v3682_v42 = vsub.f32 %v1200_v35, %v1208_v29  ;;  %v1207_v43 = vmul.f32 0.015625, %v1203_v41  ;;  %v1355_v41 = vrot.slane %v3626_v34, %v685_v37 }
 0xefa   :  { %v3684_v44 = vsub.f32 %v1199_v39, %v1207_v43  ;;  %v1212_v45 = vmul.f32 %v3682_v42, %v3682_v42 }
 0xefc   :  { %v1216_v36 = vsel %vm161_vm2, %v1212_v45, 0.0  ;;  %v1211_v27 = vmul.f32 %v3684_v44, %v3684_v44 }
 0xefd   :  { %1217 = vadd.xlane.f32.xlu0 %v1216_v36 }
 0xefe   :  { %v1213_v46 = vsel %vm161_vm2, %v1211_v27, 0.0 }
 0xeff   :  { %1214 = vadd.xlane.f32.xlu1 %v1213_v46 }
 0xf86   :  { %v1218_v3 = vpop.xlane.xlu0 %1217 }
 0xf87   :  { %v1220_v4 = vmul.f32 0.015625, %v1218_v3  ;;  %v3833_v3 = vld [vmem:[%s4045_s8 + $0x48] sm:$0xff] }
 0xf88   :  { %v1215_v5 = vpop.xlane.xlu1 %1214 }
 0xf89   :  { %v1222_v8 = vadd.f32 1e-05, %v1220_v4  ;;  %v1219_v9 = vmul.f32 0.015625, %v1215_v5  ;;  %v3840_v4 = vld [vmem:[%s4045_s8 + $0x40] sm:$0xff] }
 0xf8a   :  { %v3850_v5 = vld [vmem:[%s4046_s9] sm:$0xff]  ;;  %s3220_s9 = smov 96  }
 0xf8b   :  { %3161 = vrsqrt.f32 %v1222_v8  ;;  %v1221_v10 = vadd.f32 1e-05, %v1219_v9  ;;  %v1657_v8 = vrot.slane %v3850_v5, %v3442_v18  ;;  %v1491_v32 = vrot.slane %v3850_v5, %v3376_v33 }
 0xf8d   :  { %3163 = vrsqrt.f32 %v1221_v10 }
 0xf98   :  { %v3162_v11 = vpop.eup %3161 }
 0xf99   :  { %v1226_v13 = vmul.f32 %v3162_v11, %v3682_v42 }
 0xf9a   :  { %v3164_v14 = vpop.eup %3163 }
 0xf9b   :  { %v1225_v15 = vmul.f32 %v3164_v14, %v3684_v44  ;;  %v1232_v16 = vmul.f32 %v1230_v12, %v1226_v13 }
 0xf9d   :  { %v1231_v21 = vmul.f32 %v1230_v12, %v1225_v15  ;;  %v1238_v24 = vadd.f32 %v1236_v20, %v1232_v16  ;;  %v1462_v16 = vrot.slane %v3626_v34, %v792_v17 }
 0xf9f   :  { %v1237_v22 = vadd.f32 %v1236_v20, %v1231_v21 }
 0xfa1   :  { %2976 = vmatprep.mubr.msk.f32.mxu0 %vm161_vm2, %v1237_v22 }
 0xfa2   :  { %2977 = vmatmul.mubr.msk.f32.vlgmr.msra.gmra.mxu0 %vm161_vm2, %v1238_v24 }
 0xfa3   :  { %3015 = vmatpush3.msra.mxu0 %v1478_v59 }
 0xfa4   :  { %3016 = vmatprep.subr.mxu0 %v1477_v60 }
 0xfa5   :  { %3017 = vmatpush3.msra.mxu0 %v1477_v60 }
 0xfa6   :  { %3018 = vmatprep.subr.mxu0 %v1476_v61 }
 0xfa7   :  { %3019 = vmatpush3.msra.mxu0 %v1476_v61 }
 0xfa8   :  { %3020 = vmatprep.subr.mxu0 %v1475_v62 }
 0xfa9   :  { %3021 = vmatpush3.msra.mxu0 %v1475_v62 }
 0xfaa   :  { %3022 = vmatprep.subr.mxu0 %v1474_v63 }
 0xfab   :  { %3023 = vmatpush3.msra.mxu0 %v1474_v63 }
 0xfac   :  { %3024 = vmatprep.subr.mxu0 %v1473_v50 }
 0xfad   :  { %3025 = vmatpush3.msra.mxu0 %v1473_v50 }
 0xfae   :  { %3026 = vmatprep.subr.mxu0 %v1472_v0 }
 0xfaf   :  { %3027 = vmatpush3.msra.mxu0 %v1472_v0 }
 0xfb0   :  { %3028 = vmatprep.subr.mxu0 %v1471_v49 }
 0xfb1   :  { %3029 = vmatpush3.msra.mxu0 %v1471_v49 }
 0xfb2   :  { %3033 = vmatprep.subr.mxu0 %v3217_v28 }
0x1062   :  { %v2978_v35 = vpop.f32.mrf.mxu0 }
0x1063   :  { %v1330_v38 = vadd.f32 %v2978_v35, %v1251_v31 }
0x1064   :  { %v1324_v39 = vpop.f32.mrf.mxu0 }
0x1065   :  { %v1325_v40 = vadd.f32 %v1324_v39, %v1251_v31  ;;  %v1334_v29 = vmax.f32 %v1330_v38, 0.0 }
0x1067   :  { %v1333_v30 = vmax.f32 %v1325_v40, 0.0 }
0x1069   :  { %3011 = vmatprep.mubr.f32.mxu1 %v1333_v30 }
0x106a   :  { %3012 = vmatmul.mubr.f32.vlgmr.msra.gmra.mxu1 %v1334_v29 }
0x106b   :  { %3056 = vmatpush3.msra.mxu1 %v3820_v1  ;;  %3063 = vmatprep.mubr.msk.f32.mxu1 %vm3219_vm4, %v3217_v28 }
0x106c   :  { %3057 = vmatprep.subr.mxu1 %v3217_v28 }
0x106d   :  { %3058 = vmatpush3.msra.mxu1 %v3827_v2 }
0x106e   :  { %3059 = vmatprep.subr.mxu1 %v3217_v28 }
0x106f   :  { %3060 = vmatpush3.msra.mxu1 %v3833_v3 }
0x1070   :  { %3061 = vmatprep.subr.mxu1 %v3217_v28 }
0x1071   :  { %3062 = vmatpush3.msra.mxu1 %v3840_v4 }
0x1072   :  { %3077 = vmatprep.subr.mxu1 %v3217_v28 }
0x112a   :  { %v3013_v42 = vpop.f32.mrf.mxu1 }
0x112b   :  { %v1428_v43 = vadd.f32 %v3013_v42, %v1355_v41 }
0x112c   :  { %v1422_v44 = vpop.f32.mrf.mxu1 }
0x112d   :  { %v1423_v45 = vadd.f32 %v1422_v44, %v1355_v41  ;;  %v1432_v36 = vadd.f32 %v1428_v43, %v1238_v24  ;;  %v1468_v24 = vrot.slane %v3626_v34, %v798_v19 }
0x112f   :  { %v1436_v27 = vsel %vm161_vm2, %v1432_v36, 0.0  ;;  %v1431_v46 = vadd.f32 %v1423_v45, %v1237_v22 }
0x1130   :  { %1437 = vadd.xlane.f32.xlu0 %v1436_v27 }
0x1131   :  { %v1433_v47 = vsel %vm161_vm2, %v1431_v46, 0.0 }
0x1132   :  { %1434 = vadd.xlane.f32.xlu1 %v1433_v47 }
0x11b9   :  { %v1438_v48 = vpop.xlane.xlu0 %1437 }
0x11ba   :  { %v1440_v51 = vmul.f32 0.015625, %v1438_v48 }
0x11bb   :  { %v1435_v52 = vpop.xlane.xlu1 %1434 }
0x11bc   :  { %v3782_v53 = vsub.f32 %v1432_v36, %v1440_v51  ;;  %v1439_v54 = vmul.f32 0.015625, %v1435_v52 }
0x11be   :  { %v3784_v55 = vsub.f32 %v1431_v46, %v1439_v54  ;;  %v1444_v37 = vmul.f32 %v3782_v53, %v3782_v53 }
0x11c0   :  { %v1448_v56 = vsel %vm161_vm2, %v1444_v37, 0.0  ;;  %v1443_v57 = vmul.f32 %v3784_v55, %v3784_v55 }
0x11c1   :  { %1449 = vadd.xlane.f32.xlu0 %v1448_v56 }
0x11c2   :  { %v1445_v58 = vsel %vm161_vm2, %v1443_v57, 0.0 }
0x11c3   :  { %1446 = vadd.xlane.f32.xlu1 %v1445_v58 }
0x11d4   :  { %1659 = vrot.lane.b32.xlu1 %v1657_v8, %s3218_s11 }
0x124a   :  { %v1450_v9 = vpop.xlane.xlu0 %1449 }
0x124b   :  { %v1452_v10 = vmul.f32 0.015625, %v1450_v9 }
0x124c   :  { %v1447_v11 = vpop.xlane.xlu1 %1446 }
0x124d   :  { %v1454_v12 = vadd.f32 1e-05, %v1452_v10  ;;  %v1451_v13 = vmul.f32 0.015625, %v1447_v11 }
0x124f   :  { %3165 = vrsqrt.f32 %v1454_v12  ;;  %v1453_v14 = vadd.f32 1e-05, %v1451_v13 }
0x1250   :  { %v3890_v26 = vpop.permute.xlu1 %1659 }
0x1251   :  { %3167 = vrsqrt.f32 %v1453_v14 }
0x125c   :  { %v3166_v15 = vpop.eup %3165 }
0x125d   :  { %v1458_v20 = vmul.f32 %v3166_v15, %v3782_v53 }
0x125e   :  { %v3168_v21 = vpop.eup %3167 }
0x125f   :  { %v1457_v18 = vmul.f32 %v3168_v21, %v3784_v55  ;;  %v1464_v22 = vmul.f32 %v1462_v16, %v1458_v20 }
0x1261   :  { %v1463_v6 = vmul.f32 %v1462_v16, %v1457_v18  ;;  %v1470_v7 = vadd.f32 %v1468_v24, %v1464_v22 }
0x1263   :  { %v1469_v25 = vadd.f32 %v1468_v24, %v1463_v6 }
0x1265   :  { %3030 = vmatprep.mubr.msk.f32.mxu0 %vm161_vm2, %v1469_v25 }
0x1266   :  { %3031 = vmatmul.mubr.msk.f32.vlgmr.msra.gmra.mxu0 %vm161_vm2, %v1470_v7 }
0x1267   :  { %3034 = vmatpush3.msra.mxu0 %v3820_v1  ;;  %3041 = vmatprep.mubr.msk.f32.mxu0 %vm3219_vm4, %v3217_v28 }
0x1268   :  { %3035 = vmatprep.subr.mxu0 %v3217_v28 }
0x1269   :  { %3036 = vmatpush3.msra.mxu0 %v3827_v2 }
0x126a   :  { %3037 = vmatprep.subr.mxu0 %v3217_v28 }
0x126b   :  { %3038 = vmatpush3.msra.mxu0 %v3833_v3 }
0x126c   :  { %3039 = vmatprep.subr.mxu0 %v3217_v28 }
0x126d   :  { %3040 = vmatpush3.msra.mxu0 %v3840_v4 }
0x126e   :  { %3042 = vmatmul.mubr.f32.vlgmr.msra.gmra.mxu0 %v3217_v28  ;;  %3044 = vmatprep.subr.mxu0 %v3217_v28 }
0x126f   :  { %3045 = vmatpush3.msra.mxu0 %v3820_v1  ;;  %3052 = vmatprep.mubr.msk.f32.mxu0 %vm3219_vm4, %v3217_v28 }
0x1270   :  { %3046 = vmatprep.subr.mxu0 %v3217_v28 }
0x1271   :  { %3047 = vmatpush3.msra.mxu0 %v3827_v2 }
0x1272   :  { %3048 = vmatprep.subr.mxu0 %v3217_v28 }
0x1273   :  { %3049 = vmatpush3.msra.mxu0 %v3833_v3 }
0x1274   :  { %3050 = vmatprep.subr.mxu0 %v3217_v28 }
0x1275   :  { %3051 = vmatpush3.msra.mxu0 %v3840_v4 }
0x1276   :  { %3066 = vmatprep.subr.mxu0 %v3217_v28 }
0x1326   :  { %v3032_v17 = vpop.f32.mrf.mxu0 }
0x1327   :  { %v3888_v19 = vadd.f32 %v3032_v17, %v1491_v32 }
0x1328   :  { %v1564_v34 = vpop.f32.mrf.mxu0 }
0x1329   :  { %v3894_v39 = vadd.f32 %v1564_v34, %v1491_v32 }
0x132e   :  { %v1643_v31 = vpop.f32.mrf.mxu0 }
0x132f   :  { %v1662_v35 = vadd.f32 %v3890_v26, %v1643_v31  ;;  %v1647_v40 = vadd.f32 %v1643_v31, %v3894_v39 }
0x1330   :  { %v3043_v38 = vpop.f32.mrf.mxu0 }
0x1331   :  { %1664 = vrot.lane.b32.xlu0 %v1662_v35, %s3218_s11  ;;  %v2642_v30 = vmul.f32 -1.442695, %v1647_v40 }
0x1333   :  { %3169 = vpow2.f32 %v2642_v30 }
0x1340   :  { %v3170_v29 = vpop.eup %3169 }
0x1341   :  { %v1651_v33 = vadd.f32 1.0, %v3170_v29 }
0x1343   :  { %3171 = vrcp.f32 %v1651_v33 }
0x1350   :  { %v3172_v41 = vpop.eup %3171 }
0x13a3   :  { %v1665_v42 = vpop.permute.xlu0 %1664 }
0x13a4   :  { %v1667_v43 = vmul.f32 %v3172_v41, %v1665_v42 }
0x13a6   :  { %1669 = vrot.lane.b32.xlu1 %v1667_v43, %s3218_s11 }
0x1418   :  { %v1670_v44 = vpop.permute.xlu1 %1669 }
0x1419   :  { %v1672_v45 = vadd.f32 %v1670_v44, %v3894_v39 }
0x141b   :  { %3173 = vtanh.f32 %v1672_v45 }
0x1428   :  { %v3174_v36 = vpop.eup %3173 }
0x1429   :  { %v1674_v27 = vsub.f32 0.0, %v3174_v36 }
0x142b   :  { %1676 = vrot.lane.b32.xlu1 %v1674_v27, %s3220_s9 }
0x149d   :  { %v1677_v46 = vpop.permute.xlu1 %1676 }
0x149e   :  { %v1679_v47 = vmul.f32 %v3172_v41, %v1677_v46 }
0x14a0   :  { %1681 = vrot.lane.b32.xlu0 %v1679_v47, %s3221_s1 }
0x1512   :  { %v1682_v48 = vpop.permute.xlu0 %1681 }
0x1513   :  { %v1684_v51 = vadd.f32 %v3174_v36, %v1682_v48 }
0x1515   :  { %1686 = vrot.lane.b32.xlu1 %v1684_v51, %s3218_s11 }
0x1587   :  { %v1687_v52 = vpop.permute.xlu1 %1686 }
0x1588   :  { %3053 = vmatmul.mubr.msk.f32.vlgmr.msra.gmra.mxu0 %vm1573_vm5, %v1687_v52 }
0x1589   :  { %3067 = vmatpush3.msra.mxu0 %v3820_v1  ;;  %3074 = vmatprep.mubr.msk.f32.mxu0 %vm3219_vm4, %v3217_v28 }
0x158a   :  { %3068 = vmatprep.subr.mxu0 %v3217_v28 }
0x158b   :  { %3069 = vmatpush3.msra.mxu0 %v3827_v2 }
0x158c   :  { %3070 = vmatprep.subr.mxu0 %v3217_v28 }
0x158d   :  { %3071 = vmatpush3.msra.mxu0 %v3833_v3 }
0x158e   :  { %3072 = vmatprep.subr.mxu0 %v3217_v28 }
0x158f   :  { %3073 = vmatpush3.msra.mxu0 %v3840_v4 }
0x1590   :  { %3088 = vmatprep.subr.mxu0 %v3217_v28 }
0x1648   :  { %v1756_v53 = vpop.f32.mrf.mxu0 }
0x1649   :  { %v1770_v54 = vadd.f32 %v1756_v53, %v3890_v26  ;;  %v1761_v56 = vrot.slane %v1756_v53, 6 }
0x164a   :  { %v3054_v55 = vpop.f32.mrf.mxu0 }
0x164b   :  { %v1772_v37 = vrot.slane %v1770_v54, 6  ;;  %v1763_v57 = vadd.f32 %v1761_v56, %v3894_v39 }
0x164d   :  { %1773 = vrot.lane.b32.xlu0 %v1772_v37, %s3218_s11  ;;  %v2644_v58 = vmul.f32 -1.442695, %v1763_v57 }
0x164f   :  { %3175 = vpow2.f32 %v2644_v58 }
0x165c   :  { %v3176_v59 = vpop.eup %3175 }
0x165d   :  { %v1767_v60 = vadd.f32 1.0, %v3176_v59 }
0x165f   :  { %3177 = vrcp.f32 %v1767_v60 }
0x166c   :  { %v3178_v61 = vpop.eup %3177 }
0x16bf   :  { %v1774_v62 = vpop.permute.xlu0 %1773 }
0x16c0   :  { %v1776_v63 = vmul.f32 %v3178_v61, %v1774_v62 }
0x16c2   :  { %1778 = vrot.lane.b32.xlu1 %v1776_v63, %s3218_s11 }
0x1734   :  { %v1779_v50 = vpop.permute.xlu1 %1778 }
0x1735   :  { %v1781_v0 = vadd.f32 %v1779_v50, %v3894_v39 }
0x1737   :  { %3179 = vtanh.f32 %v1781_v0 }
0x1744   :  { %v3180_v49 = vpop.eup %3179 }
0x1745   :  { %v1784_v8 = vrot.slane %v3180_v49, 2 }
0x1747   :  { %v1786_v9 = vsub.f32 %v1684_v51, %v1784_v8 }
0x1749   :  { %v1788_v10 = vrot.slane %v1786_v9, 6 }
0x174b   :  { %1789 = vrot.lane.b32.xlu0 %v1788_v10, %s3220_s9 }
0x17bd   :  { %v1790_v11 = vpop.permute.xlu0 %1789 }
0x17be   :  { %v1792_v12 = vmul.f32 %v3178_v61, %v1790_v11 }
0x17c0   :  { %1794 = vrot.lane.b32.xlu1 %v1792_v12, %s3221_s1 }
0x1832   :  { %v1795_v13 = vpop.permute.xlu1 %1794 }
0x1833   :  { %v1797_v14 = vadd.f32 %v3180_v49, %v1795_v13 }
0x1835   :  { %v1799_v15 = vrot.slane %v1797_v14, 2 }
0x1837   :  { %1800 = vrot.lane.b32.xlu0 %v1799_v15, %s3218_s11 }
0x18a9   :  { %v1801_v16 = vpop.permute.xlu0 %1800 }
0x18aa   :  { %3064 = vmatmul.mubr.msk.f32.vlgmr.msra.gmra.mxu1 %vm1573_vm5, %v1801_v16 }
0x18ab   :  { %3078 = vmatpush3.msra.mxu1 %v3820_v1  ;;  %3085 = vmatprep.mubr.msk.f32.mxu1 %vm3219_vm4, %v3217_v28 }
0x18ac   :  { %3079 = vmatprep.subr.mxu1 %v3217_v28 }
0x18ad   :  { %3080 = vmatpush3.msra.mxu1 %v3827_v2 }
0x18ae   :  { %3081 = vmatprep.subr.mxu1 %v3217_v28 }
0x18af   :  { %3082 = vmatpush3.msra.mxu1 %v3833_v3 }
0x18b0   :  { %3083 = vmatprep.subr.mxu1 %v3217_v28 }
0x18b1   :  { %3084 = vmatpush3.msra.mxu1 %v3840_v4 }
0x18b2   :  { %3099 = vmatprep.subr.mxu1 %v3217_v28 }
0x196a   :  { %v1870_v20 = vpop.f32.mrf.mxu1 }
0x196b   :  { %v1884_v21 = vadd.f32 %v1870_v20, %v3890_v26  ;;  %v1875_v24 = vrot.slane %v1870_v20, 4 }
0x196c   :  { %v3065_v18 = vpop.f32.mrf.mxu1 }
0x196d   :  { %v1886_v22 = vrot.slane %v1884_v21, 4  ;;  %v1877_v6 = vadd.f32 %v1875_v24, %v3894_v39 }
0x196f   :  { %1887 = vrot.lane.b32.xlu1 %v1886_v22, %s3218_s11  ;;  %v2646_v25 = vmul.f32 -1.442695, %v1877_v6 }
0x1971   :  { %3181 = vpow2.f32 %v2646_v25 }
0x197e   :  { %v3182_v7 = vpop.eup %3181 }
0x197f   :  { %v1881_v32 = vadd.f32 1.0, %v3182_v7 }
0x1981   :  { %3183 = vrcp.f32 %v1881_v32 }
0x198e   :  { %v3184_v17 = vpop.eup %3183 }
0x19e1   :  { %v1888_v34 = vpop.permute.xlu1 %1887 }
0x19e2   :  { %v1890_v31 = vmul.f32 %v3184_v17, %v1888_v34 }
0x19e4   :  { %1892 = vrot.lane.b32.xlu0 %v1890_v31, %s3218_s11 }
0x1a56   :  { %v1893_v35 = vpop.permute.xlu0 %1892 }
0x1a57   :  { %v1895_v38 = vadd.f32 %v1893_v35, %v3894_v39 }
0x1a59   :  { %3185 = vtanh.f32 %v1895_v38 }
0x1a66   :  { %v3186_v40 = vpop.eup %3185 }
0x1a67   :  { %v1898_v30 = vrot.slane %v3186_v40, 2 }
0x1a69   :  { %v1900_v29 = vsub.f32 %v1797_v14, %v1898_v30 }
0x1a6b   :  { %v1902_v33 = vrot.slane %v1900_v29, 6 }
0x1a6d   :  { %1903 = vrot.lane.b32.xlu1 %v1902_v33, %s3220_s9 }
0x1adf   :  { %v1904_v41 = vpop.permute.xlu1 %1903 }
0x1ae0   :  { %v1906_v42 = vmul.f32 %v3184_v17, %v1904_v41 }
0x1ae2   :  { %1908 = vrot.lane.b32.xlu0 %v1906_v42, %s3221_s1 }
0x1b54   :  { %v1909_v43 = vpop.permute.xlu0 %1908 }
0x1b55   :  { %v1911_v44 = vadd.f32 %v3186_v40, %v1909_v43 }
0x1b57   :  { %v1913_v45 = vrot.slane %v1911_v44, 4 }
0x1b59   :  { %1914 = vrot.lane.b32.xlu1 %v1913_v45, %s3218_s11 }
0x1bcb   :  { %v1915_v36 = vpop.permute.xlu1 %1914 }
0x1bcc   :  { %3075 = vmatmul.mubr.msk.f32.vlgmr.msra.gmra.mxu0 %vm1573_vm5, %v1915_v36 }
0x1bcd   :  { %3089 = vmatpush3.msra.mxu0 %v3820_v1  ;;  %3096 = vmatprep.mubr.msk.f32.mxu0 %vm3219_vm4, %v3217_v28 }
0x1bce   :  { %3090 = vmatprep.subr.mxu0 %v3217_v28 }
0x1bcf   :  { %3091 = vmatpush3.msra.mxu0 %v3827_v2 }
0x1bd0   :  { %3092 = vmatprep.subr.mxu0 %v3217_v28 }
0x1bd1   :  { %3093 = vmatpush3.msra.mxu0 %v3833_v3 }
0x1bd2   :  { %3094 = vmatprep.subr.mxu0 %v3217_v28 }
0x1bd3   :  { %3095 = vmatpush3.msra.mxu0 %v3840_v4 }
0x1bd4   :  { %3110 = vmatprep.subr.mxu0 %v3217_v28 }
0x1c8c   :  { %v1984_v27 = vpop.f32.mrf.mxu0 }
0x1c8d   :  { %v1998_v46 = vadd.f32 %v1984_v27, %v3890_v26  ;;  %v1989_v51 = vrot.slane %v1984_v27, 2 }
0x1c8e   :  { %v3076_v47 = vpop.f32.mrf.mxu0 }
0x1c8f   :  { %v2000_v48 = vrot.slane %v1998_v46, 2  ;;  %v1991_v52 = vadd.f32 %v1989_v51, %v3894_v39 }
0x1c91   :  { %2001 = vrot.lane.b32.xlu0 %v2000_v48, %s3218_s11  ;;  %v2648_v53 = vmul.f32 -1.442695, %v1991_v52 }
0x1c93   :  { %3187 = vpow2.f32 %v2648_v53 }
0x1ca0   :  { %v3188_v54 = vpop.eup %3187 }
0x1ca1   :  { %v1995_v55 = vadd.f32 1.0, %v3188_v54 }
0x1ca3   :  { %3189 = vrcp.f32 %v1995_v55 }
0x1cb0   :  { %v3190_v37 = vpop.eup %3189 }
0x1d03   :  { %v2002_v56 = vpop.permute.xlu0 %2001 }
0x1d04   :  { %v2004_v57 = vmul.f32 %v3190_v37, %v2002_v56 }
0x1d06   :  { %2006 = vrot.lane.b32.xlu1 %v2004_v57, %s3218_s11 }
0x1d78   :  { %v2007_v58 = vpop.permute.xlu1 %2006 }
0x1d79   :  { %v2009_v59 = vadd.f32 %v2007_v58, %v3894_v39 }
0x1d7b   :  { %3191 = vtanh.f32 %v2009_v59 }
0x1d88   :  { %v3192_v60 = vpop.eup %3191 }
0x1d89   :  { %v2012_v61 = vrot.slane %v3192_v60, 2 }
0x1d8b   :  { %v2014_v62 = vsub.f32 %v1911_v44, %v2012_v61 }
0x1d8d   :  { %v2016_v63 = vrot.slane %v2014_v62, 6 }
0x1d8f   :  { %2017 = vrot.lane.b32.xlu0 %v2016_v63, %s3220_s9 }
0x1e01   :  { %v2018_v50 = vpop.permute.xlu0 %2017 }
0x1e02   :  { %v2020_v0 = vmul.f32 %v3190_v37, %v2018_v50 }
0x1e04   :  { %2022 = vrot.lane.b32.xlu1 %v2020_v0, %s3221_s1 }
0x1e76   :  { %v2023_v49 = vpop.permute.xlu1 %2022 }
0x1e77   :  { %v2025_v8 = vadd.f32 %v3192_v60, %v2023_v49 }
0x1e79   :  { %v2027_v9 = vrot.slane %v2025_v8, 6 }
0x1e7b   :  { %2028 = vrot.lane.b32.xlu0 %v2027_v9, %s3218_s11 }
0x1eed   :  { %v2029_v10 = vpop.permute.xlu0 %2028 }
0x1eee   :  { %3086 = vmatmul.mubr.msk.f32.vlgmr.msra.gmra.mxu1 %vm1573_vm5, %v2029_v10 }
0x1eef   :  { %3100 = vmatpush3.msra.mxu1 %v3820_v1  ;;  %3107 = vmatprep.mubr.msk.f32.mxu1 %vm3219_vm4, %v3217_v28 }
0x1ef0   :  { %3101 = vmatprep.subr.mxu1 %v3217_v28 }
0x1ef1   :  { %3102 = vmatpush3.msra.mxu1 %v3827_v2 }
0x1ef2   :  { %3103 = vmatprep.subr.mxu1 %v3217_v28 }
0x1ef3   :  { %3104 = vmatpush3.msra.mxu1 %v3833_v3 }
0x1ef4   :  { %3105 = vmatprep.subr.mxu1 %v3217_v28 }
0x1ef5   :  { %3106 = vmatpush3.msra.mxu1 %v3840_v4 }
0x1ef6   :  { %3121 = vmatprep.subr.mxu1 %v3217_v28 }
0x1fae   :  { %v2098_v39 = vpop.f32.mrf.mxu1 }
0x1faf   :  { %v2109_v11 = vadd.f32 %v2098_v39, %v3890_v26  ;;  %v2102_v13 = vadd.f32 %v2098_v39, %v3888_v19 }
0x1fb0   :  { %v3087_v12 = vpop.f32.mrf.mxu1 }
0x1fb1   :  { %2111 = vrot.lane.b32.xlu1 %v2109_v11, %s3218_s11  ;;  %v2650_v14 = vmul.f32 -1.442695, %v2102_v13 }
0x1fb3   :  { %3193 = vpow2.f32 %v2650_v14 }
0x1fc0   :  { %v3194_v15 = vpop.eup %3193 }
0x1fc1   :  { %v2106_v16 = vadd.f32 1.0, %v3194_v15 }
0x1fc3   :  { %3195 = vrcp.f32 %v2106_v16 }
0x1fd0   :  { %v3196_v20 = vpop.eup %3195 }
0x2023   :  { %v2112_v21 = vpop.permute.xlu1 %2111 }
0x2024   :  { %v2114_v18 = vmul.f32 %v3196_v20, %v2112_v21 }
0x2026   :  { %2116 = vrot.lane.b32.xlu0 %v2114_v18, %s3218_s11 }
0x2098   :  { %v2117_v22 = vpop.permute.xlu0 %2116 }
0x2099   :  { %v2119_v24 = vadd.f32 %v2117_v22, %v3888_v19 }
0x209b   :  { %3197 = vtanh.f32 %v2119_v24 }
0x20a8   :  { %v3198_v6 = vpop.eup %3197 }
0x20a9   :  { %v2122_v25 = vrot.slane %v3198_v6, 2 }
0x20ab   :  { %v2124_v7 = vsub.f32 %v2025_v8, %v2122_v25 }
0x20ad   :  { %v2126_v32 = vrot.slane %v2124_v7, 6 }
0x20af   :  { %2127 = vrot.lane.b32.xlu1 %v2126_v32, %s3220_s9 }
0x2121   :  { %v2128_v17 = vpop.permute.xlu1 %2127 }
0x2122   :  { %v2130_v34 = vmul.f32 %v3196_v20, %v2128_v17 }
0x2124   :  { %2132 = vrot.lane.b32.xlu0 %v2130_v34, %s3221_s1 }
0x2196   :  { %v2133_v31 = vpop.permute.xlu0 %2132 }
0x2197   :  { %v2135_v35 = vadd.f32 %v3198_v6, %v2133_v31 }
0x2199   :  { %2137 = vrot.lane.b32.xlu1 %v2135_v35, %s3218_s11 }
0x220b   :  { %v2138_v38 = vpop.permute.xlu1 %2137 }
0x220c   :  { %3097 = vmatmul.mubr.msk.f32.vlgmr.msra.gmra.mxu0 %vm1573_vm5, %v2138_v38 }
0x220d   :  { %3111 = vmatpush3.msra.mxu0 %v3820_v1  ;;  %3118 = vmatprep.mubr.msk.f32.mxu0 %vm3219_vm4, %v3217_v28 }
0x220e   :  { %3112 = vmatprep.subr.mxu0 %v3217_v28 }
0x220f   :  { %3113 = vmatpush3.msra.mxu0 %v3827_v2 }
0x2210   :  { %3114 = vmatprep.subr.mxu0 %v3217_v28 }
0x2211   :  { %3115 = vmatpush3.msra.mxu0 %v3833_v3 }
0x2212   :  { %3116 = vmatprep.subr.mxu0 %v3217_v28 }
0x2213   :  { %3117 = vmatpush3.msra.mxu0 %v3840_v4 }
0x22cc   :  { %v2207_v40 = vpop.f32.mrf.mxu0 }
0x22cd   :  { %v2221_v30 = vadd.f32 %v2207_v40, %v3890_v26  ;;  %v2212_v33 = vrot.slane %v2207_v40, 6 }
0x22ce   :  { %v3098_v29 = vpop.f32.mrf.mxu0 }
0x22cf   :  { %v2223_v1 = vrot.slane %v2221_v30, 6  ;;  %v2214_v41 = vadd.f32 %v2212_v33, %v3888_v19 }
0x22d1   :  { %2224 = vrot.lane.b32.xlu0 %v2223_v1, %s3218_s11  ;;  %v2652_v42 = vmul.f32 -1.442695, %v2214_v41 }
0x22d3   :  { %3199 = vpow2.f32 %v2652_v42  ;;  %v1486_v42 = vld [vmem:[%s4045_s8 + $0x78] sm:$0xff] }
0x22e0   :  { %v3200_v2 = vpop.eup %3199 }
0x22e1   :  { %v2218_v43 = vadd.f32 1.0, %v3200_v2  ;;  %v1485_v2 = vld [vmem:[%s4045_s8 + $0x70] sm:$0xff] }
0x22e3   :  { %3201 = vrcp.f32 %v2218_v43  ;;  %v1483_v43 = vld [vmem:[%s4045_s8 + $0x60] sm:$0xff] }
0x22f0   :  { %v3202_v3 = vpop.eup %3201 }
0x2343   :  { %v2225_v44 = vpop.permute.xlu0 %2224 }
0x2344   :  { %v2227_v45 = vmul.f32 %v3202_v3, %v2225_v44 }
0x2346   :  { %2229 = vrot.lane.b32.xlu1 %v2227_v45, %s3218_s11 }
0x23b8   :  { %v2230_v4 = vpop.permute.xlu1 %2229 }
0x23b9   :  { %v2232_v36 = vadd.f32 %v2230_v4, %v3888_v19 }
0x23bb   :  { %3203 = vtanh.f32 %v2232_v36 }
0x23c8   :  { %v3204_v27 = vpop.eup %3203 }
0x23c9   :  { %v2235_v46 = vrot.slane %v3204_v27, 2 }
0x23cb   :  { %v2237_v47 = vsub.f32 %v2135_v35, %v2235_v46  ;;  %v2480_v46 = vrot.slane %v3850_v5, %v3546_v23 }
0x23cd   :  { %v2239_v48 = vrot.slane %v2237_v47, 6 }
0x23cf   :  { %2240 = vrot.lane.b32.xlu0 %v2239_v48, %s3220_s9 }
0x2441   :  { %v2241_v51 = vpop.permute.xlu0 %2240 }
0x2442   :  { %v2243_v52 = vmul.f32 %v3202_v3, %v2241_v51 }
0x2444   :  { %2245 = vrot.lane.b32.xlu1 %v2243_v52, %s3221_s1 }
0x24b6   :  { %v2246_v53 = vpop.permute.xlu1 %2245 }
0x24b7   :  { %v2248_v54 = vadd.f32 %v3204_v27, %v2246_v53 }
0x24b9   :  { %v2250_v55 = vrot.slane %v2248_v54, 2 }
0x24bb   :  { %2251 = vrot.lane.b32.xlu0 %v2250_v55, %s3218_s11 }
0x252d   :  { %v2252_v37 = vpop.permute.xlu0 %2251 }
0x252e   :  { %3108 = vmatmul.mubr.msk.f32.vlgmr.msra.gmra.mxu1 %vm1573_vm5, %v2252_v37 }
0x252f   :  { %3129 = vmatprep.mubr.msk.f32.mxu1 %vm3219_vm4, %v3217_v28  ;;  %3122 = vmatpush3.msra.mxu1 %v1486_v42 }
0x2530   :  { %3123 = vmatprep.subr.mxu1 %v3217_v28 }
0x2531   :  { %3124 = vmatpush3.msra.mxu1 %v1485_v2 }
0x2532   :  { %3125 = vmatprep.subr.mxu1 %v3217_v28 }
0x25ee   :  { %v2321_v56 = vpop.f32.mrf.mxu1 }
0x25ef   :  { %v2335_v57 = vadd.f32 %v2321_v56, %v3890_v26  ;;  %v2326_v60 = vrot.slane %v2321_v56, 4 }
0x25f0   :  { %v3109_v58 = vpop.f32.mrf.mxu1 }
0x25f1   :  { %v2337_v59 = vrot.slane %v2335_v57, 4  ;;  %v2328_v61 = vadd.f32 %v2326_v60, %v3888_v19 }
0x25f3   :  { %2338 = vrot.lane.b32.xlu1 %v2337_v59, %s3218_s11  ;;  %v2654_v62 = vmul.f32 -1.442695, %v2328_v61 }
0x25f5   :  { %3205 = vpow2.f32 %v2654_v62 }
0x2602   :  { %v3206_v63 = vpop.eup %3205 }
0x2603   :  { %v2332_v50 = vadd.f32 1.0, %v3206_v63 }
0x2605   :  { %3207 = vrcp.f32 %v2332_v50 }
0x2612   :  { %v3208_v0 = vpop.eup %3207 }
0x2665   :  { %v2339_v49 = vpop.permute.xlu1 %2338 }
0x2666   :  { %v2341_v8 = vmul.f32 %v3208_v0, %v2339_v49 }
0x2668   :  { %2343 = vrot.lane.b32.xlu0 %v2341_v8, %s3218_s11 }
0x26da   :  { %v2344_v9 = vpop.permute.xlu0 %2343 }
0x26db   :  { %v2346_v10 = vadd.f32 %v2344_v9, %v3888_v19 }
0x26dd   :  { %3209 = vtanh.f32 %v2346_v10 }
0x26ea   :  { %v3210_v39 = vpop.eup %3209 }
0x26eb   :  { %v2349_v11 = vrot.slane %v3210_v39, 2 }
0x26ed   :  { %v2351_v12 = vsub.f32 %v2248_v54, %v2349_v11 }
0x26ef   :  { %v2353_v13 = vrot.slane %v2351_v12, 6 }
0x26f1   :  { %2354 = vrot.lane.b32.xlu1 %v2353_v13, %s3220_s9 }
0x2763   :  { %v2355_v14 = vpop.permute.xlu1 %2354 }
0x2764   :  { %v2357_v15 = vmul.f32 %v3208_v0, %v2355_v14 }
0x2766   :  { %2359 = vrot.lane.b32.xlu0 %v2357_v15, %s3221_s1 }
0x27d8   :  { %v2360_v16 = vpop.permute.xlu0 %2359 }
0x27d9   :  { %v2362_v20 = vadd.f32 %v3210_v39, %v2360_v16 }
0x27db   :  { %v2364_v21 = vrot.slane %v2362_v20, 4 }
0x27dd   :  { %2365 = vrot.lane.b32.xlu1 %v2364_v21, %s3218_s11 }
0x284f   :  { %v2366_v18 = vpop.permute.xlu1 %2365 }
0x2850   :  { %3119 = vmatmul.mubr.msk.f32.vlgmr.msra.gmra.mxu0 %vm1573_vm5, %v2366_v18 }
0x2910   :  { %v2435_v22 = vpop.f32.mrf.mxu0 }
0x2911   :  { %v2449_v24 = vadd.f32 %v2435_v22, %v3890_v26  ;;  %v2440_v7 = vrot.slane %v2435_v22, 2 }
0x2912   :  { %v3120_v6 = vpop.f32.mrf.mxu0 }
0x2913   :  { %v2451_v25 = vrot.slane %v2449_v24, 2  ;;  %v2442_v32 = vadd.f32 %v2440_v7, %v3888_v19 }
0x2915   :  { %2452 = vrot.lane.b32.xlu0 %v2451_v25, %s3218_s11  ;;  %v2656_v17 = vmul.f32 -1.442695, %v2442_v32 }
0x2917   :  { %3211 = vpow2.f32 %v2656_v17 }
0x2924   :  { %v3212_v34 = vpop.eup %3211 }
0x2925   :  { %v2446_v31 = vadd.f32 1.0, %v3212_v34 }
0x2927   :  { %3213 = vrcp.f32 %v2446_v31 }
0x2934   :  { %v3214_v35 = vpop.eup %3213 }
0x2987   :  { %v2453_v38 = vpop.permute.xlu0 %2452 }
0x2988   :  { %v2455_v40 = vmul.f32 %v3214_v35, %v2453_v38 }
0x298a   :  { %2457 = vrot.lane.b32.xlu1 %v2455_v40, %s3218_s11 }
0x29fc   :  { %v2458_v30 = vpop.permute.xlu1 %2457 }
0x29fd   :  { %v2460_v26 = vadd.f32 %v2458_v30, %v3888_v19  ;;  %v1484_v19 = vld [vmem:[%s4045_s8 + $0x68] sm:$0xff] }
0x29fe   :  { %3126 = vmatpush3.msra.mxu1 %v1484_v19 }
0x29ff   :  { %3215 = vtanh.f32 %v2460_v26  ;;  %3127 = vmatprep.subr.mxu1 %v3217_v28 }
0x2a00   :  { %3128 = vmatpush3.msra.mxu1 %v1483_v43 }
0x2a0c   :  { %v3216_v29 = vpop.eup %3215 }
0x2a0d   :  { %v2463_v1 = vrot.slane %v3216_v29, 2 }
0x2a0f   :  { %v2465_v33 = vsub.f32 %v2362_v20, %v2463_v1 }
0x2a11   :  { %v2467_v41 = vrot.slane %v2465_v33, 6 }
0x2a13   :  { %2468 = vrot.lane.b32.xlu0 %v2467_v41, %s3220_s9 }
0x2a85   :  { %v2469_v3 = vpop.permute.xlu0 %2468 }
0x2a86   :  { %v2471_v44 = vmul.f32 %v3214_v35, %v2469_v3 }
0x2a88   :  { %2473 = vrot.lane.b32.xlu1 %v2471_v44, %s3221_s1 }
0x2afa   :  { %v2474_v45 = vpop.permute.xlu1 %2473 }
0x2afb   :  { %v2476_v4 = vadd.f32 %v3216_v29, %v2474_v45 }
0x2afd   :  { %v2482_v36 = vrot.slane %v2476_v4, 6 }
0x2aff   :  { %2483 = vrot.lane.b32.xlu0 %v2482_v36, %s3218_s11 }
0x2b71   :  { %v2484_v27 = vpop.permute.xlu0 %2483 }
0x2b72   :  { %3130 = vmatmul.mubr.msk.f32.vlgmr.msra.gmra.mxu1 %vm1573_vm5, %v2484_v27 }
0x2c32   :  { %v2553_v47 = vpop.f32.mrf.mxu1 }
0x2c33   :  { %v2554_v48 = vadd.f32 %v2553_v47, %v2480_v46 }
0x2c34   :  { %v3131_v51 = vpop.f32.mrf.mxu1 }
0x2c35   :  { %2558 = vst.msk [vmem:[%s4047_s10] sm:$0x3] %vm2557_vm6, %v2554_v48 }

</bundles_post_ra>
